<compile_context>
chip_gen: v5e
topology: v5e:2x2
jax: 0.10.0
libtpu: 0.0.40
codegen_flags: <defaults>
</compile_context>

<pallas_src>
import numpy as np

import jax
import jax.numpy as jnp
from jax.experimental import pallas as pl
from jax.experimental.pallas import tpu as pltpu

NDF = 16
BN_EPS = 1e-5
LEAKY_SLOPE = 0.2

# Static conv hyper-params of the torch module: (kernel, stride, pad) per layer.
_CONV_CFG = ((8, 4, 1), (8, 4, 1), (8, 4, 1), (2, 1, 0))


def _conv_out_len(length, k, s, p):
    return (length + 2 * p - k) // s + 1


# ----------------------------------------------------------------------------- fused Pallas kernel

def _disc_fused_kernel(x_ref, w1_ref, s1_ref, w2_ref, s2_ref, w3_ref, s3_ref,
                       w4_ref, s4_ref, o_ref):
    """Entire discriminator forward: 4 batched matmuls; activations never leave VMEM."""

    def leaky(y):
        return jnp.where(y >= 0.0, y, LEAKY_SLOPE * y)

    a = x_ref[...]                                                                  # (B, L0*1)
    a = leaky(jnp.dot(a, w1_ref[...], preferred_element_type=jnp.float32) + s1_ref[...])
    a = leaky(jnp.dot(a, w2_ref[...], preferred_element_type=jnp.float32) + s2_ref[...])
    a = leaky(jnp.dot(a, w3_ref[...], preferred_element_type=jnp.float32) + s3_ref[...])
    y = jnp.dot(a, w4_ref[...], preferred_element_type=jnp.float32) + s4_ref[...]   # (B, 1)
    # sigmoid: exp on EUP + EUP reciprocal (no VPU divide, no inf blow-up)
    o_ref[...] = pl.reciprocal(1.0 + jnp.exp(-y), approx=True)


# ----------------------------------------------------------------------------- parameter folding

def prepare_params(params, seq_len):
    """Host-side fold of each Conv1d (+bias, +eval BN) into a dense Toeplitz matmul.

    Flattened activation layout is (position major, channel minor): idx = l*C + c, which makes
    consecutive layers' layouts line up without any in-kernel reshapes/transposes.
    Returns (W1, s1, W2, s2, W3, s3, W4, s4) with W_l: (L_in*Cin, L_out*Cout), s_l: (1, L_out*Cout).
    """
    lengths = [seq_len]
    for (k, s, p) in _CONV_CFG:
        lengths.append(_conv_out_len(lengths[-1], k, s, p))

    prepared = []
    for li, (name, (ksize, stride, pad)) in enumerate(zip(("c1", "c2", "c3", "c4"), _CONV_CFG)):
        layer = params[name]
        w = np.asarray(layer["w"], np.float32)              # (Cout, Cin, K)
        b = np.asarray(layer["b"], np.float32)              # (Cout,)
        cout, cin, _ = w.shape
        l_in, l_out = lengths[li], lengths[li + 1]

        if "bn" in layer:                                   # eval-mode BN folded per out-channel
            gamma, beta, mean, var = (np.asarray(t, np.float32) for t in layer["bn"])
            scale = gamma / np.sqrt(var + BN_EPS)
            shift = b * scale + beta - mean * scale
        else:
            scale = np.ones((cout,), np.float32)
            shift = b

        w_scaled = w * scale[:, None, None]                 # (Cout, Cin, K)
        toeplitz = np.zeros((l_in * cin, l_out * cout), np.float32)
        for t in range(l_out):
            for k in range(ksize):
                l = stride * t + k - pad
                if 0 <= l < l_in:                           # zero padding = all-zero rows
                    toeplitz[l * cin:(l + 1) * cin, t * cout:(t + 1) * cout] += w_scaled[:, :, k].T
        shift_flat = np.tile(shift, l_out).reshape(1, l_out * cout)

        prepared.append(jnp.asarray(toeplitz, dtype=jnp.float32))
        prepared.append(jnp.asarray(shift_flat, dtype=jnp.float32))
    return tuple(prepared)


# ----------------------------------------------------------------------------- wrapper

@jax.jit
def discriminator_forward(x, prepared):
    """x: (B, L) -> (B, 1), matching torch.squeeze(out, dim=2). Single grid-less pallas_call."""
    B, _ = x.shape
    operands = (x.astype(jnp.float32),) + tuple(prepared)   # Cin=1, so flattened input == x
    vmem = pl.BlockSpec(memory_space=pltpu.MemorySpace.VMEM)
    return pl.pallas_call(
        _disc_fused_kernel,
        out_shape=jax.ShapeDtypeStruct((B, 1), jnp.float32),
        in_specs=[vmem] * len(operands),
        out_specs=vmem,
    )(*operands)


# ----------------------------------------------------------------------------- reference (pure JAX)

def _conv1d_ref(x, w, b, stride, pad):
    y = jax.lax.conv_general_dilated(
        x, w, window_strides=(stride,), padding=[(pad, pad)],
        dimension_numbers=("NCH", "OIH", "NCH"),
        precision=jax.lax.Precision.HIGHEST)
    return y + b[None, :, None]


def discriminator_ref(x, params):
    def bn_eval(y, bn):
        gamma, beta, mean, var = bn
        inv = 1.0 / jnp.sqrt(var + BN_EPS)
        return gamma[None, :, None] * (y - mean[None, :, None]) * inv[None, :, None] + beta[None, :, None]

    def leaky(y):
        return jnp.where(y >= 0.0, y, LEAKY_SLOPE * y)

    B, L = x.shape
    out = x.reshape(B, 1, L)
    out = leaky(_conv1d_ref(out, params["c1"]["w"], params["c1"]["b"], 4, 1))
    out = leaky(bn_eval(_conv1d_ref(out, params["c2"]["w"], params["c2"]["b"], 4, 1), params["c2"]["bn"]))
    out = leaky(bn_eval(_conv1d_ref(out, params["c3"]["w"], params["c3"]["b"], 4, 1), params["c3"]["bn"]))
    out = jax.nn.sigmoid(_conv1d_ref(out, params["c4"]["w"], params["c4"]["b"], 1, 0))
    return jnp.squeeze(out, axis=2)


# ----------------------------------------------------------------------------- params

def init_params(key):
    def conv_init(k, cout, cin, ksz):
        kw, kb = jax.random.split(k)
        bound = 1.0 / np.sqrt(cin * ksz)
        w = jax.random.uniform(kw, (cout, cin, ksz), jnp.float32, -bound, bound)
        b = jax.random.uniform(kb, (cout,), jnp.float32, -bound, bound)
        return w, b

    def bn_init(k, c):
        k1, k2, k3, k4 = jax.random.split(k, 4)
        gamma = 1.0 + 0.1 * jax.random.normal(k1, (c,), jnp.float32)
        beta = 0.1 * jax.random.normal(k2, (c,), jnp.float32)
        mean = 0.1 * jax.random.normal(k3, (c,), jnp.float32)
        var = jax.random.uniform(k4, (c,), jnp.float32, 0.5, 1.5)
        return gamma, beta, mean, var

    k1, k2, k3, k4, kb2, kb3 = jax.random.split(key, 6)
    w1, b1 = conv_init(k1, NDF, 1, 8)
    w2, b2 = conv_init(k2, NDF * 2, NDF, 8)
    w3, b3 = conv_init(k3, NDF * 4, NDF * 2, 8)
    w4, b4 = conv_init(k4, 1, NDF * 4, 2)
    return {
        "c1": {"w": w1, "b": b1},
        "c2": {"w": w2, "b": b2, "bn": bn_init(kb2, NDF * 2)},
        "c3": {"w": w3, "b": b3, "bn": bn_init(kb3, NDF * 4)},
        "c4": {"w": w4, "b": b4},
    }


# ----------------------------------------------------------------------------- main

if __name__ == "__main__":
    B, L = 2, 178   # UCI-epileptic style 1-D signal; L=178 gives conv lengths 44 -> 10 -> 2 -> 1
    key = jax.random.PRNGKey(0)
    kx, kp = jax.random.split(key)
    x = jax.random.normal(kx, (B, L), dtype=jnp.float32)
    params = init_params(kp)
    prepared = prepare_params(params, L)

    y = discriminator_forward(x, prepared)
    y = jax.block_until_ready(y)

    y_ref = jax.block_until_ready(discriminator_ref(x, params))

    assert y.shape == (B, 1), y.shape
    np.testing.assert_allclose(np.asarray(y), np.asarray(y_ref), rtol=1e-2, atol=1e-2)
    assert np.all(np.isfinite(np.asarray(y)))
    print("KERNEL_OK")
</pallas_src>

<mosaic_0001>
module attributes {stable_mosaic.version = 11 : i64} {
  func.func @_disc_fused_kernel(%arg0: memref<2x178xf32, #tpu.memory_space<vmem>>, %arg1: memref<178x704xf32, #tpu.memory_space<vmem>>, %arg2: memref<1x704xf32, #tpu.memory_space<vmem>>, %arg3: memref<704x320xf32, #tpu.memory_space<vmem>>, %arg4: memref<1x320xf32, #tpu.memory_space<vmem>>, %arg5: memref<320x128xf32, #tpu.memory_space<vmem>>, %arg6: memref<1x128xf32, #tpu.memory_space<vmem>>, %arg7: memref<128x1xf32, #tpu.memory_space<vmem>>, %arg8: memref<1x1xf32, #tpu.memory_space<vmem>>, %arg9: memref<2x1xf32, #tpu.memory_space<vmem>>) attributes {dimension_semantics = [], scalar_prefetch = 0 : i64, scratch_operands = 0 : i64, tpu.core_type = #tpu.core_type<tc>} {
    %c0 = arith.constant 0 : index
    %c0_0 = arith.constant 0 : index
    %0 = vector.load %arg0[%c0, %c0_0] : memref<2x178xf32, #tpu.memory_space<vmem>>, vector<2x178xf32>
    %c0_1 = arith.constant 0 : index
    %c0_2 = arith.constant 0 : index
    %1 = vector.load %arg1[%c0_1, %c0_2] : memref<178x704xf32, #tpu.memory_space<vmem>>, vector<178x704xf32>
    %cst = arith.constant dense<0.000000e+00> : vector<2x704xf32>
    %2 = tpu.matmul %0, %1, %cst {dimension_numbers = #tpu.dot_dimension_numbers<[1], [0], [0], [1], [0, 0, 1, 1], [], []>} : vector<2x178xf32>, vector<178x704xf32>, vector<2x704xf32> -> vector<2x704xf32>
    %c0_3 = arith.constant 0 : index
    %c0_4 = arith.constant 0 : index
    %3 = vector.load %arg2[%c0_3, %c0_4] : memref<1x704xf32, #tpu.memory_space<vmem>>, vector<1x704xf32>
    %4 = vector.broadcast %3 : vector<1x704xf32> to vector<2x704xf32>
    %5 = arith.addf %2, %4 : vector<2x704xf32>
    %cst_5 = arith.constant 0.000000e+00 : f32
    %6 = vector.broadcast %cst_5 : f32 to vector<2x704xf32>
    %7 = arith.cmpf oge, %5, %6 : vector<2x704xf32>
    %cst_6 = arith.constant 2.000000e-01 : f32
    %8 = vector.broadcast %cst_6 : f32 to vector<2x704xf32>
    %9 = arith.mulf %8, %5 : vector<2x704xf32>
    %10 = arith.select %7, %5, %9 : vector<2x704xi1>, vector<2x704xf32>
    %c0_7 = arith.constant 0 : index
    %c0_8 = arith.constant 0 : index
    %11 = vector.load %arg3[%c0_7, %c0_8] : memref<704x320xf32, #tpu.memory_space<vmem>>, vector<704x320xf32>
    %cst_9 = arith.constant dense<0.000000e+00> : vector<2x320xf32>
    %12 = tpu.matmul %10, %11, %cst_9 {dimension_numbers = #tpu.dot_dimension_numbers<[1], [0], [0], [1], [0, 0, 1, 1], [], []>} : vector<2x704xf32>, vector<704x320xf32>, vector<2x320xf32> -> vector<2x320xf32>
    %c0_10 = arith.constant 0 : index
    %c0_11 = arith.constant 0 : index
    %13 = vector.load %arg4[%c0_10, %c0_11] : memref<1x320xf32, #tpu.memory_space<vmem>>, vector<1x320xf32>
    %14 = vector.broadcast %13 : vector<1x320xf32> to vector<2x320xf32>
    %15 = arith.addf %12, %14 : vector<2x320xf32>
    %cst_12 = arith.constant 0.000000e+00 : f32
    %16 = vector.broadcast %cst_12 : f32 to vector<2x320xf32>
    %17 = arith.cmpf oge, %15, %16 : vector<2x320xf32>
    %cst_13 = arith.constant 2.000000e-01 : f32
    %18 = vector.broadcast %cst_13 : f32 to vector<2x320xf32>
    %19 = arith.mulf %18, %15 : vector<2x320xf32>
    %20 = arith.select %17, %15, %19 : vector<2x320xi1>, vector<2x320xf32>
    %c0_14 = arith.constant 0 : index
    %c0_15 = arith.constant 0 : index
    %21 = vector.load %arg5[%c0_14, %c0_15] : memref<320x128xf32, #tpu.memory_space<vmem>>, vector<320x128xf32>
    %cst_16 = arith.constant dense<0.000000e+00> : vector<2x128xf32>
    %22 = tpu.matmul %20, %21, %cst_16 {dimension_numbers = #tpu.dot_dimension_numbers<[1], [0], [0], [1], [0, 0, 1, 1], [], []>} : vector<2x320xf32>, vector<320x128xf32>, vector<2x128xf32> -> vector<2x128xf32>
    %c0_17 = arith.constant 0 : index
    %c0_18 = arith.constant 0 : index
    %23 = vector.load %arg6[%c0_17, %c0_18] : memref<1x128xf32, #tpu.memory_space<vmem>>, vector<1x128xf32>
    %24 = vector.broadcast %23 : vector<1x128xf32> to vector<2x128xf32>
    %25 = arith.addf %22, %24 : vector<2x128xf32>
    %cst_19 = arith.constant 0.000000e+00 : f32
    %26 = vector.broadcast %cst_19 : f32 to vector<2x128xf32>
    %27 = arith.cmpf oge, %25, %26 : vector<2x128xf32>
    %cst_20 = arith.constant 2.000000e-01 : f32
    %28 = vector.broadcast %cst_20 : f32 to vector<2x128xf32>
    %29 = arith.mulf %28, %25 : vector<2x128xf32>
    %30 = arith.select %27, %25, %29 : vector<2x128xi1>, vector<2x128xf32>
    %c0_21 = arith.constant 0 : index
    %c0_22 = arith.constant 0 : index
    %31 = vector.load %arg7[%c0_21, %c0_22] : memref<128x1xf32, #tpu.memory_space<vmem>>, vector<128x1xf32>
    %cst_23 = arith.constant dense<0.000000e+00> : vector<2x1xf32>
    %32 = tpu.matmul %30, %31, %cst_23 {dimension_numbers = #tpu.dot_dimension_numbers<[1], [0], [0], [1], [0, 0, 1, 1], [], []>} : vector<2x128xf32>, vector<128x1xf32>, vector<2x1xf32> -> vector<2x1xf32>
    %c0_24 = arith.constant 0 : index
    %c0_25 = arith.constant 0 : index
    %33 = vector.load %arg8[%c0_24, %c0_25] : memref<1x1xf32, #tpu.memory_space<vmem>>, vector<1x1xf32>
    %34 = vector.broadcast %33 : vector<1x1xf32> to vector<2x1xf32>
    %35 = arith.addf %32, %34 : vector<2x1xf32>
    %cst_26 = arith.constant 0.000000e+00 : f32
    %36 = vector.broadcast %cst_26 : f32 to vector<2x1xf32>
    %37 = arith.subf %36, %35 : vector<2x1xf32>
    %38 = math.exp %37 : vector<2x1xf32>
    %cst_27 = arith.constant 1.000000e+00 : f32
    %39 = vector.broadcast %cst_27 : f32 to vector<2x1xf32>
    %40 = arith.addf %39, %38 : vector<2x1xf32>
    %41 = tpu.reciprocal %40 {approx = true} : vector<2x1xf32> -> vector<2x1xf32>
    %c0_28 = arith.constant 0 : index
    %c0_29 = arith.constant 0 : index
    %42 = vector.load %arg9[%c0_28, %c0_29] : memref<2x1xf32, #tpu.memory_space<vmem>>, vector<2x1xf32>
    tpu.vector_store %arg9[%c0_28, %c0_29], %41 {strides = array<i32>} : memref<2x1xf32, #tpu.memory_space<vmem>>, vector<2x1xf32>,
    return
  }
}

</mosaic_0001>

<bundles_post_ra>
// kernel: discriminator_forward.1
= control target key start
LH: loop header
LB: loop body
LE: loop exit
PB: predicated region body
PF: predicated region fallthrough
CT: control target
= control target key end

     0   :  { %vm195_vm0 = vcmask 1041408   ;;  %vm192_vm1 = vcmask 408576   ;;  %vm744_vm8 = vcmask 523264   ;;  %vm1272_vm13 = vcmask 1024   ;;  %s2817_s1 = inlined_call_operand.vmem [shape: f32[178,704], index: 1, kind: input, shape index: {}]   ;;  %s2818_s0 = inlined_call_operand.vmem [shape: f32[2,178], index: 0, kind: input, shape index: {}]   ;;  %s2819_s3 = inlined_call_operand.vmem [shape: f32[704,320], index: 3, kind: input, shape index: {}]   ;;  %s2820_s2 = inlined_call_operand.vmem [shape: f32[1,704], index: 2, kind: input, shape index: {}]   ;;  %s2821_s5 = inlined_call_operand.vmem [shape: f32[320,128], index: 5, kind: input, shape index: {}]   ;;  %s2822_s6 = inlined_call_operand.vmem [shape: f32[1,128], index: 6, kind: input, shape index: {}]   ;;  %s2823_s4 = inlined_call_operand.vmem [shape: f32[1,320], index: 4, kind: input, shape index: {}]   ;;  %s2824_s7 = inlined_call_operand.vmem [shape: f32[128,1], index: 7, kind: input, shape index: {}]   ;;  %s2825_s8 = inlined_call_operand.<no memory space> [shape: f32[1,1], index: 8, kind: input, shape index: {}]   ;;  %s2826_s9 = inlined_call_operand.vmem [shape: f32[2,1], index: 9, kind: output, shape index: {}]  }
   0x1   :  { %v167_v0 = vld [vmem:[%s2817_s1 + $0x420] sm:$0x3]  ;;  %v126_v1 = vld [vmem:[%s2817_s1 + $0x2d8] sm:$0xff]  ;;  %v168_v2 = vld [vmem:[%s2817_s1 + $0x428] sm:$0x3] }
   0x2   :  { %1278 = vmatpush.msk.msra.mxu1 %vm195_vm0, %v167_v0  ;;  %254 = vmatpush.msra.mxu2 %v126_v1  ;;  %v161_v3 = vld [vmem:[%s2817_s1 + $0x3f0] sm:$0xff]  ;;  %v120_v4 = vld [vmem:[%s2817_s1 + $0x2a8] sm:$0xff]  ;;  %v162_v5 = vld [vmem:[%s2817_s1 + $0x3f8] sm:$0xff] }
   0x3   :  { %1280 = vmatpush.msk.msra.mxu3 %vm195_vm0, %v168_v2  ;;  %v155_v6 = vld [vmem:[%s2817_s1 + $0x3c0] sm:$0xff]  ;;  %v114_v7 = vld [vmem:[%s2817_s1 + $0x278] sm:$0xff]  ;;  %v156_v8 = vld [vmem:[%s2817_s1 + $0x3c8] sm:$0xff] }
   0x4   :  { %244 = vmatpush.msra.mxu1 %v161_v3  ;;  %255 = vmatpush.msra.mxu2 %v120_v4  ;;  %v149_v9 = vld [vmem:[%s2817_s1 + $0x390] sm:$0xff]  ;;  %v108_v10 = vld [vmem:[%s2817_s1 + $0x248] sm:$0xff]  ;;  %v150_v12 = vld [vmem:[%s2817_s1 + $0x398] sm:$0xff] }
   0x5   :  { %284 = vmatpush.msra.mxu3 %v162_v5  ;;  %v125_v11 = vld [vmem:[%s2817_s1 + $0x2d0] sm:$0xff]  ;;  %v119_v13 = vld [vmem:[%s2817_s1 + $0x2a0] sm:$0xff]  ;;  %v102_v15 = vld [vmem:[%s2817_s1 + $0x218] sm:$0xff] }
   0x6   :  { %245 = vmatpush.msra.mxu1 %v155_v6  ;;  %256 = vmatpush.msra.mxu2 %v114_v7  ;;  %v143_v14 = vld [vmem:[%s2817_s1 + $0x360] sm:$0xff]  ;;  %v144_v16 = vld [vmem:[%s2817_s1 + $0x368] sm:$0xff]  ;;  %v113_v17 = vld [vmem:[%s2817_s1 + $0x270] sm:$0xff] }
   0x7   :  { %285 = vmatpush.msra.mxu3 %v156_v8  ;;  %214 = vmatpush.msra.mxu0 %v125_v11  ;;  %v137_v18 = vld [vmem:[%s2817_s1 + $0x330] sm:$0xff]  ;;  %v96_v19 = vld [vmem:[%s2817_s1 + $0x1e8] sm:$0xff]  ;;  %v138_v20 = vld [vmem:[%s2817_s1 + $0x338] sm:$0xff] }
   0x8   :  { %246 = vmatpush.msra.mxu1 %v149_v9  ;;  %257 = vmatpush.msra.mxu2 %v108_v10  ;;  %v107_v21 = vld [vmem:[%s2817_s1 + $0x240] sm:$0xff]  ;;  %v90_v23 = vld [vmem:[%s2817_s1 + $0x1b8] sm:$0xff]  ;;  %v132_v24 = vld [vmem:[%s2817_s1 + $0x308] sm:$0xff] }
   0x9   :  { %286 = vmatpush.msra.mxu3 %v150_v12  ;;  %215 = vmatpush.msra.mxu0 %v119_v13  ;;  %v131_v22 = vld [vmem:[%s2817_s1 + $0x300] sm:$0xff]  ;;  %v169_v26 = vld [vmem:[%s2817_s1 + $0x430] sm:$0x3]  ;;  %v84_v27 = vld [vmem:[%s2817_s1 + $0x188] sm:$0xff] }
   0xa   :  { %247 = vmatpush.msra.mxu1 %v143_v14  ;;  %258 = vmatpush.msra.mxu2 %v102_v15  ;;  %v127_v25 = vld [vmem:[%s2817_s1 + $0x2e0] sm:$0xff]  ;;  %v121_v28 = vld [vmem:[%s2817_s1 + $0x2b0] sm:$0xff]  ;;  %v78_v31 = vld [vmem:[%s2817_s1 + $0x158] sm:$0xff] }
   0xb   :  { %287 = vmatpush.msra.mxu3 %v144_v16  ;;  %216 = vmatpush.msra.mxu0 %v113_v17  ;;  %v101_v29 = vld [vmem:[%s2817_s1 + $0x210] sm:$0xff]  ;;  %v163_v30 = vld [vmem:[%s2817_s1 + $0x400] sm:$0xff]  ;;  %v72_v35 = vld [vmem:[%s2817_s1 + $0x128] sm:$0xff] }
   0xc   :  { %248 = vmatpush.msra.mxu1 %v137_v18  ;;  %259 = vmatpush.msra.mxu2 %v96_v19  ;;  %v115_v32 = vld [vmem:[%s2817_s1 + $0x280] sm:$0xff]  ;;  %v157_v34 = vld [vmem:[%s2817_s1 + $0x3d0] sm:$0xff]  ;;  %v66_v40 = vld [vmem:[%s2817_s1 + $0xf8] sm:$0xff] }
   0xd   :  { %288 = vmatpush.msra.mxu3 %v138_v20  ;;  %217 = vmatpush.msra.mxu0 %v107_v21  ;;  %v95_v33 = vld [vmem:[%s2817_s1 + $0x1e0] sm:$0xff]  ;;  %v109_v36 = vld [vmem:[%s2817_s1 + $0x250] sm:$0xff]  ;;  %v60_v44 = vld [vmem:[%s2817_s1 + $0xc8] sm:$0xff] }
   0xe   :  { %249 = vmatpush.msra.mxu1 %v131_v22  ;;  %260 = vmatpush.msra.mxu2 %v90_v23  ;;  %v89_v37 = vld [vmem:[%s2817_s1 + $0x1b0] sm:$0xff]  ;;  %v34_v38 = vld [vmem:[%s2818_s0] sm:$0xf]  ;;  %v54_v48 = vld [vmem:[%s2817_s1 + $0x98] sm:$0xff] }
   0xf   :  { %289 = vmatpush.msra.mxu3 %v132_v24  ;;  %218 = vmatpush.msra.mxu0 %v101_v29  ;;  %v151_v39 = vld [vmem:[%s2817_s1 + $0x3a0] sm:$0xff]  ;;  %188 = vst [vmem:[#allocation1] ss:$4 sm:$0xff] %v34_v38  ;;  %v145_v43 = vld [vmem:[%s2817_s1 + $0x370] sm:$0xff]  ;;  %v48_v52 = vld [vmem:[%s2817_s1 + $0x68] sm:$0xff] }
  0x10   :  { %294 = vmatpush.msrb.mxu1 %v127_v25  ;;  %261 = vmatpush.msra.mxu2 %v84_v27  ;;  %v103_v41 = vld [vmem:[%s2817_s1 + $0x220] sm:$0xff]  ;;  %v97_v45 = vld [vmem:[%s2817_s1 + $0x1f0] sm:$0xff]  ;;  %v128_v55 = vld [vmem:[%s2817_s1 + $0x2e8] sm:$0xff] }
  0x11   :  { %1282 = vmatpush.msk.msrb.mxu3 %vm195_vm0, %v169_v26  ;;  %219 = vmatpush.msra.mxu0 %v95_v33  ;;  %v83_v42 = vld [vmem:[%s2817_s1 + $0x180] sm:$0xff]  ;;  %v77_v46 = vld [vmem:[%s2817_s1 + $0x150] sm:$0xff]  ;;  %v42_v57 = vld [vmem:[%s2817_s1 + $0x38] sm:$0xff] }
  0x12   :  { %295 = vmatpush.msrb.mxu1 %v121_v28  ;;  %262 = vmatpush.msra.mxu2 %v78_v31  ;;  %v139_v47 = vld [vmem:[%s2817_s1 + $0x340] sm:$0xff]  ;;  %v133_v51 = vld [vmem:[%s2817_s1 + $0x310] sm:$0xff]  ;;  %v122_v59 = vld [vmem:[%s2817_s1 + $0x2b8] sm:$0xff] }
  0x13   :  { %324 = vmatpush.msrb.mxu3 %v163_v30  ;;  %220 = vmatpush.msra.mxu0 %v89_v37  ;;  %v91_v49 = vld [vmem:[%s2817_s1 + $0x1c0] sm:$0xff]  ;;  %v85_v54 = vld [vmem:[%s2817_s1 + $0x190] sm:$0xff]  ;;  %v36_v61 = vld [vmem:[%s2817_s1 + $0x8] sm:$0xff] }
  0x14   :  { %296 = vmatpush.msrb.mxu1 %v115_v32  ;;  %263 = vmatpush.msra.mxu2 %v72_v35  ;;  %v71_v50 = vld [vmem:[%s2817_s1 + $0x120] sm:$0xff]  ;;  %v65_v56 = vld [vmem:[%s2817_s1 + $0xf0] sm:$0xff]  ;;  %v116_v63 = vld [vmem:[%s2817_s1 + $0x288] sm:$0xff] }
  0x15   :  { %325 = vmatpush.msrb.mxu3 %v157_v34  ;;  %221 = vmatpush.msra.mxu0 %v83_v42  ;;  %v79_v58 = vld [vmem:[%s2817_s1 + $0x160] sm:$0xff]  ;;  %v73_v62 = vld [vmem:[%s2817_s1 + $0x130] sm:$0xff]  ;;  %v110_v3 = vld [vmem:[%s2817_s1 + $0x258] sm:$0xff] }
  0x16   :  { %297 = vmatpush.msrb.mxu1 %v109_v36  ;;  %264 = vmatpush.msra.mxu2 %v66_v40  ;;  %v1512_v53 = vld.sshfl [vmem:[#allocation1 + $0x8] sm:$0xff pattern:$0x73625140]  ;;  %v59_v60 = vld [vmem:[%s2817_s1 + $0xc0] sm:$0xff]  ;;  %v129_v1 = vld [vmem:[%s2817_s1 + $0x2f0] sm:$0xff] }
  0x17   :  { %326 = vmatpush.msrb.mxu3 %v151_v39  ;;  %222 = vmatpush.msra.mxu0 %v77_v46  ;;  %v1546_v0 = vld.sshfl [vmem:[#allocation1] sm:$0xff pattern:$0x73625140]  ;;  %v53_v2 = vld [vmem:[%s2817_s1 + $0x90] sm:$0xff]  ;;  %v104_v7 = vld [vmem:[%s2817_s1 + $0x228] sm:$0xff] }
  0x18   :  { %298 = vmatpush.msrb.mxu1 %v103_v41  ;;  %265 = vmatpush.msra.mxu2 %v60_v44  ;;  %v67_v4 = vld [vmem:[%s2817_s1 + $0x100] sm:$0xff]  ;;  %v61_v8 = vld [vmem:[%s2817_s1 + $0xd0] sm:$0xff]  ;;  %v98_v11 = vld [vmem:[%s2817_s1 + $0x1f8] sm:$0xff] }
  0x19   :  { %327 = vmatpush.msrb.mxu3 %v145_v43  ;;  %223 = vmatpush.msra.mxu0 %v71_v50  ;;  %v123_v5 = vld [vmem:[%s2817_s1 + $0x2c0] sm:$0xff]  ;;  %v117_v9 = vld [vmem:[%s2817_s1 + $0x290] sm:$0xff]  ;;  %v92_v15 = vld [vmem:[%s2817_s1 + $0x1c8] sm:$0xff] }
  0x1a   :  { %299 = vmatpush.msrb.mxu1 %v97_v45  ;;  %266 = vmatpush.msra.mxu2 %v54_v48  ;;  %v47_v6 = vld [vmem:[%s2817_s1 + $0x60] sm:$0xff]  ;;  %v41_v10 = vld [vmem:[%s2817_s1 + $0x30] sm:$0xff]  ;;  %v170_v17 = vld [vmem:[%s2817_s1 + $0x438] sm:$0x3] }
  0x1b   :  { %328 = vmatpush.msrb.mxu3 %v139_v47  ;;  %224 = vmatpush.msra.mxu0 %v65_v56  ;;  %v55_v12 = vld [vmem:[%s2817_s1 + $0xa0] sm:$0xff]  ;;  %v49_v16 = vld [vmem:[%s2817_s1 + $0x70] sm:$0xff]  ;;  %v86_v19 = vld [vmem:[%s2817_s1 + $0x198] sm:$0xff] }
  0x1c   :  { %300 = vmatpush.msrb.mxu1 %v91_v49  ;;  %267 = vmatpush.msra.mxu2 %v48_v52  ;;  %v111_v13 = vld [vmem:[%s2817_s1 + $0x260] sm:$0xff]  ;;  %v105_v18 = vld [vmem:[%s2817_s1 + $0x230] sm:$0xff]  ;;  %v164_v21 = vld [vmem:[%s2817_s1 + $0x408] sm:$0xff] }
  0x1d   :  { %329 = vmatpush.msrb.mxu3 %v133_v51  ;;  %225 = vmatpush.msra.mxu0 %v59_v60  ;;  %v35_v14 = vld [vmem:[%s2817_s1] sm:$0xff]  ;;  %v80_v23 = vld [vmem:[%s2817_s1 + $0x168] sm:$0xff]  ;;  %v37_v24 = vld [vmem:[%s2817_s1 + $0x10] sm:$0xff] }
  0x1e   :  { %1281 = vmatmul.msk.f32.vlgmr.msra.gmra.mxu3 %vm192_vm1, %v1512_v53  ;;  %301 = vmatpush.msrb.mxu1 %v85_v54  ;;  %v43_v20 = vld [vmem:[%s2817_s1 + $0x40] sm:$0xff]  ;;  %v158_v25 = vld [vmem:[%s2817_s1 + $0x3d8] sm:$0xff]  ;;  %v93_v26 = vld [vmem:[%s2817_s1 + $0x1d0] sm:$0xff] }
  0x1f   :  { %334 = vmatpush.msra.mxu3 %v128_v55  ;;  %268 = vmatpush.msra.mxu2 %v42_v57  ;;  %v99_v22 = vld [vmem:[%s2817_s1 + $0x200] sm:$0xff]  ;;  %v74_v27 = vld [vmem:[%s2817_s1 + $0x138] sm:$0xff]  ;;  %v152_v28 = vld [vmem:[%s2817_s1 + $0x3a8] sm:$0xff] }
  0x20   :  { %302 = vmatpush.msrb.mxu1 %v79_v58  ;;  %226 = vmatpush.msra.mxu0 %v53_v2  ;;  %v87_v29 = vld [vmem:[%s2817_s1 + $0x1a0] sm:$0xff]  ;;  %v130_v30 = vld [vmem:[%s2817_s1 + $0x2f8] sm:$0xff]  ;;  %v68_v31 = vld [vmem:[%s2817_s1 + $0x108] sm:$0xff] }
  0x21   :  { %335 = vmatpush.msra.mxu3 %v122_v59  ;;  %269 = vmatpush.msra.mxu2 %v36_v61  ;;  %v146_v32 = vld [vmem:[%s2817_s1 + $0x378] sm:$0xff]  ;;  %v81_v33 = vld [vmem:[%s2817_s1 + $0x170] sm:$0xff]  ;;  %v124_v34 = vld [vmem:[%s2817_s1 + $0x2c8] sm:$0xff] }
  0x22   :  { %303 = vmatpush.msrb.mxu1 %v73_v62  ;;  %270 = vmatmul.f32.vlgmr.msra.gmra.mxu2 %v1546_v0  ;;  %v62_v35 = vld [vmem:[%s2817_s1 + $0xd8] sm:$0xff]  ;;  %v140_v36 = vld [vmem:[%s2817_s1 + $0x348] sm:$0xff]  ;;  %v75_v37 = vld [vmem:[%s2817_s1 + $0x140] sm:$0xff] }
  0x23   :  { %336 = vmatpush.msra.mxu3 %v116_v63  ;;  %374 = vmatpush.msrb.mxu2 %v129_v1  ;;  %v118_v38 = vld [vmem:[%s2817_s1 + $0x298] sm:$0xff]  ;;  %v56_v39 = vld [vmem:[%s2817_s1 + $0xa8] sm:$0xff]  ;;  %v69_v40 = vld [vmem:[%s2817_s1 + $0x110] sm:$0xff] }
  0x24   :  { %304 = vmatpush.msrb.mxu1 %v67_v4  ;;  %227 = vmatpush.msra.mxu0 %v47_v6  ;;  %v134_v41 = vld [vmem:[%s2817_s1 + $0x318] sm:$0xff]  ;;  %v112_v42 = vld [vmem:[%s2817_s1 + $0x268] sm:$0xff]  ;;  %v171_v44 = vld [vmem:[%s2817_s1 + $0x440] sm:$0x3] }
  0x25   :  { %337 = vmatpush.msra.mxu3 %v110_v3  ;;  %375 = vmatpush.msrb.mxu2 %v123_v5  ;;  %v50_v43 = vld [vmem:[%s2817_s1 + $0x78] sm:$0xff]  ;;  %v63_v45 = vld [vmem:[%s2817_s1 + $0xe0] sm:$0xff]  ;;  %v44_v47 = vld [vmem:[%s2817_s1 + $0x48] sm:$0xff] }
  0x26   :  { %305 = vmatpush.msrb.mxu1 %v61_v8  ;;  %228 = vmatpush.msra.mxu0 %v41_v10  ;;  %v106_v46 = vld [vmem:[%s2817_s1 + $0x238] sm:$0xff]  ;;  %v165_v48 = vld [vmem:[%s2817_s1 + $0x410] sm:$0xff]  ;;  %v100_v50 = vld [vmem:[%s2817_s1 + $0x208] sm:$0xff] }
  0x27   :  { %338 = vmatpush.msra.mxu3 %v104_v7  ;;  %376 = vmatpush.msrb.mxu2 %v117_v9  ;;  %v57_v49 = vld [vmem:[%s2817_s1 + $0xb0] sm:$0xff]  ;;  %v38_v51 = vld [vmem:[%s2817_s1 + $0x18] sm:$0xff]  ;;  %v159_v52 = vld [vmem:[%s2817_s1 + $0x3e0] sm:$0xff] }
  0x28   :  { %1279 = vmatmul.msk.f32.vlgmr.msra.gmra.mxu1 %vm192_vm1, %v1512_v53  ;;  %229 = vmatpush.msra.mxu0 %v35_v14  ;;  %v51_v54 = vld [vmem:[%s2817_s1 + $0x80] sm:$0xff]  ;;  %v94_v55 = vld [vmem:[%s2817_s1 + $0x1d8] sm:$0xff]  ;;  %v153_v56 = vld [vmem:[%s2817_s1 + $0x3b0] sm:$0xff] }
  0x29   :  { %339 = vmatpush.msra.mxu3 %v98_v11  ;;  %306 = vmatpush.msrb.mxu1 %v55_v12  ;;  %v45_v57 = vld [vmem:[%s2817_s1 + $0x50] sm:$0xff]  ;;  %v88_v58 = vld [vmem:[%s2817_s1 + $0x1a8] sm:$0xff]  ;;  %v147_v59 = vld [vmem:[%s2817_s1 + $0x380] sm:$0xff] }
  0x2a   :  { %377 = vmatpush.msrb.mxu2 %v111_v13  ;;  %1284 = vmatpush.msk.msrb.mxu0 %vm195_vm0, %v170_v17  ;;  %v39_v60 = vld [vmem:[%s2817_s1 + $0x20] sm:$0xff]  ;;  %v517_v61 = vld [vmem:[%s2819_s3 + $0x168] sm:$0xff]  ;;  %v82_v62 = vld [vmem:[%s2817_s1 + $0x178] sm:$0xff] }
  0x2b   :  { %340 = vmatpush.msra.mxu3 %v92_v15  ;;  %307 = vmatpush.msrb.mxu1 %v49_v16  ;;  %v141_v63 = vld [vmem:[%s2817_s1 + $0x350] sm:$0xff]  ;;  %v565_v1 = vld [vmem:[%s2819_s3 + $0x2e8] sm:$0xff]  ;;  %v135_v4 = vld [vmem:[%s2817_s1 + $0x320] sm:$0xff] }
  0x2c   :  { %378 = vmatpush.msrb.mxu2 %v105_v18  ;;  %1283 = vmatmul.msk.f32.vlgmr.msrb.gmra.mxu3 %vm192_vm1, %v1512_v53  ;;  %v76_v2 = vld [vmem:[%s2817_s1 + $0x148] sm:$0xff]  ;;  %v514_v3 = vld [vmem:[%s2819_s3 + $0x150] sm:$0xff]  ;;  %v70_v6 = vld [vmem:[%s2817_s1 + $0x118] sm:$0xff] }
  0x2d   :  { %341 = vmatpush.msra.mxu3 %v86_v19  ;;  %308 = vmatpush.msrb.mxu1 %v43_v20  ;;  %v562_v5 = vld [vmem:[%s2819_s3 + $0x2d0] sm:$0xff]  ;;  %v172_v7 = vld [vmem:[%s2817_s1 + $0x448] sm:$0x3]  ;;  %v559_v8 = vld [vmem:[%s2819_s3 + $0x2b8] sm:$0xff] }
  0x2e   :  { %364 = vmatpush.msrb.mxu0 %v164_v21  ;;  %379 = vmatpush.msrb.mxu2 %v99_v22  ;;  %v64_v9 = vld [vmem:[%s2817_s1 + $0xe8] sm:$0xff]  ;;  %v166_v10 = vld [vmem:[%s2817_s1 + $0x418] sm:$0xff]  ;;  %v556_v11 = vld [vmem:[%s2819_s3 + $0x2a0] sm:$0xff] }
  0x2f   :  { %342 = vmatpush.msra.mxu3 %v80_v23  ;;  %309 = vmatpush.msrb.mxu1 %v37_v24  ;;  %v511_v12 = vld [vmem:[%s2819_s3 + $0x138] sm:$0xff]  ;;  %v160_v14 = vld [vmem:[%s2817_s1 + $0x3e8] sm:$0xff]  ;;  %v508_v16 = vld [vmem:[%s2819_s3 + $0x120] sm:$0xff] }
  0x30   :  { %365 = vmatpush.msrb.mxu0 %v158_v25  ;;  %380 = vmatpush.msrb.mxu2 %v93_v26  ;;  %v58_v13 = vld [vmem:[%s2817_s1 + $0xb8] sm:$0xff]  ;;  %v553_v15 = vld [vmem:[%s2819_s3 + $0x288] sm:$0xff]  ;;  %v550_v19 = vld [vmem:[%s2819_s3 + $0x270] sm:$0xff] }
  0x31   :  { %310 = vmatmul.f32.vlgmr.msrb.gmra.mxu1 %v1546_v0  ;;  %343 = vmatpush.msra.mxu3 %v74_v27  ;;  %v52_v17 = vld [vmem:[%s2817_s1 + $0x88] sm:$0xff]  ;;  %v154_v18 = vld [vmem:[%s2817_s1 + $0x3b8] sm:$0xff]  ;;  %v502_v24 = vld [vmem:[%s2819_s3 + $0xf0] sm:$0xff] }
  0x32   :  { %366 = vmatpush.msrb.mxu0 %v152_v28  ;;  %381 = vmatpush.msrb.mxu2 %v87_v29  ;;  %v505_v20 = vld [vmem:[%s2819_s3 + $0x108] sm:$0xff]  ;;  %v46_v21 = vld [vmem:[%s2817_s1 + $0x58] sm:$0xff]  ;;  %v544_v27 = vld [vmem:[%s2819_s3 + $0x240] sm:$0xff] }
  0x33   :  { %414 = vmatpush.msra.mxu1 %v130_v30  ;;  %344 = vmatpush.msra.mxu3 %v68_v31  ;;  %v148_v22 = vld [vmem:[%s2817_s1 + $0x388] sm:$0xff]  ;;  %v547_v23 = vld [vmem:[%s2819_s3 + $0x258] sm:$0xff] }
  0x34   :  { %367 = vmatpush.msrb.mxu0 %v146_v32  ;;  %382 = vmatpush.msrb.mxu2 %v81_v33  ;;  %v40_v25 = vld [vmem:[%s2817_s1 + $0x28] sm:$0xff]  ;;  %v142_v26 = vld [vmem:[%s2817_s1 + $0x358] sm:$0xff]  ;;  %v538_v33 = vld [vmem:[%s2819_s3 + $0x210] sm:$0xff] }
  0x35   :  { %415 = vmatpush.msra.mxu1 %v124_v34  ;;  %345 = vmatpush.msra.mxu3 %v62_v35  ;;  %v136_v28 = vld [vmem:[%s2817_s1 + $0x328] sm:$0xff]  ;;  %v499_v32 = vld [vmem:[%s2819_s3 + $0xd8] sm:$0xff]  ;;  %v658_v34 = vld [vmem:[%s2819_s3 + $0x5d0] sm:$0xff] }
  0x36   :  { %368 = vmatpush.msrb.mxu0 %v140_v36  ;;  %383 = vmatpush.msrb.mxu2 %v75_v37  ;;  %v661_v29 = vld [vmem:[%s2819_s3 + $0x5e8] sm:$0xff]  ;;  %v496_v35 = vld [vmem:[%s2819_s3 + $0xc0] sm:$0xff]  ;;  %v535_v36 = vld [vmem:[%s2819_s3 + $0x1f8] sm:$0xff] }
  0x37   :  { %416 = vmatpush.msra.mxu1 %v118_v38  ;;  %346 = vmatpush.msra.mxu3 %v56_v39  ;;  %v541_v30 = vld [vmem:[%s2819_s3 + $0x228] sm:$0xff]  ;;  %v655_v37 = vld [vmem:[%s2819_s3 + $0x5b8] sm:$0xff]  ;;  %v532_v39 = vld [vmem:[%s2819_s3 + $0x1e0] sm:$0xff] }
  0x38   :  { %230 = vmatmul.f32.vlgmr.msra.gmra.mxu0 %v1546_v0  ;;  %384 = vmatpush.msrb.mxu2 %v69_v40  ;;  %v613_v31 = vld [vmem:[%s2819_s3 + $0x468] sm:$0xff]  ;;  %v652_v40 = vld [vmem:[%s2819_s3 + $0x5a0] sm:$0xff] }
  0x39   :  { %369 = vmatpush.msrb.mxu0 %v134_v41  ;;  %417 = vmatpush.msra.mxu1 %v112_v42  ;;  %v493_v38 = vld [vmem:[%s2819_s3 + $0xa8] sm:$0xff]  ;;  %v604_v41 = vld [vmem:[%s2819_s3 + $0x420] sm:$0xff]  ;;  %v490_v42 = vld [vmem:[%s2819_s3 + $0x90] sm:$0xff] }
  0x3a   :  { %347 = vmatpush.msra.mxu3 %v50_v43  ;;  %385 = vmatpush.msrb.mxu2 %v63_v45  ;;  %v529_v43 = vld [vmem:[%s2819_s3 + $0x1c8] sm:$0xff] }
  0x3b   :  { %1286 = vmatpush.msk.msra.mxu0 %vm195_vm0, %v171_v44  ;;  %418 = vmatpush.msra.mxu1 %v106_v46  ;;  %v649_v44 = vld [vmem:[%s2819_s3 + $0x588] sm:$0xff]  ;;  %v487_v46 = vld [vmem:[%s2819_s3 + $0x78] sm:$0xff] }
  0x3c   :  { %348 = vmatpush.msra.mxu3 %v44_v47  ;;  %386 = vmatpush.msrb.mxu2 %v57_v49  ;;  %v601_v45 = vld [vmem:[%s2819_s3 + $0x408] sm:$0xff]  ;;  %v526_v47 = vld [vmem:[%s2819_s3 + $0x1b0] sm:$0xff] }
  0x3d   :  { %404 = vmatpush.msra.mxu0 %v165_v48  ;;  %419 = vmatpush.msra.mxu1 %v100_v50  ;;  %v646_v48 = vld [vmem:[%s2819_s3 + $0x570] sm:$0xff]  ;;  %v484_v50 = vld [vmem:[%s2819_s3 + $0x60] sm:$0xff] }
  0x3e   :  { %349 = vmatpush.msra.mxu3 %v38_v51  ;;  %387 = vmatpush.msrb.mxu2 %v51_v54  ;;  %v598_v49 = vld [vmem:[%s2819_s3 + $0x3f0] sm:$0xff]  ;;  %v523_v51 = vld [vmem:[%s2819_s3 + $0x198] sm:$0xff] }
  0x3f   :  { %405 = vmatpush.msra.mxu0 %v159_v52  ;;  %350 = vmatmul.f32.vlgmr.msra.gmra.mxu3 %v1546_v0  ;;  %v643_v52 = vld [vmem:[%s2819_s3 + $0x558] sm:$0xff] }
  0x40   :  { %420 = vmatpush.msra.mxu1 %v94_v55  ;;  %388 = vmatpush.msrb.mxu2 %v45_v57  ;;  %v595_v54 = vld [vmem:[%s2819_s3 + $0x3d8] sm:$0xff]  ;;  %v481_v55 = vld [vmem:[%s2819_s3 + $0x48] sm:$0xff]  ;;  %v640_v57 = vld [vmem:[%s2819_s3 + $0x540] sm:$0xff] }
  0x41   :  { %406 = vmatpush.msra.mxu0 %v153_v56  ;;  %748 = vmatpush.msrb.mxu3 %v517_v61  ;;  %v520_v56 = vld [vmem:[%s2819_s3 + $0x180] sm:$0xff]  ;;  %v637_v61 = vld [vmem:[%s2819_s3 + $0x528] sm:$0xff] }
  0x42   :  { %1285 = vmatmul.msk.f32.vlgmr.msrb.gmra.mxu0 %vm192_vm1, %v1512_v53  ;;  %421 = vmatpush.msra.mxu1 %v88_v58  ;;  %v592_v58 = vld [vmem:[%s2819_s3 + $0x3c0] sm:$0xff] }
  0x43   :  { %407 = vmatpush.msra.mxu0 %v147_v59  ;;  %389 = vmatpush.msrb.mxu2 %v39_v60  ;;  %v614_v59 = vld [vmem:[%s2819_s3 + $0x470] sm:$0xff] }
  0x44   :  { %422 = vmatpush.msra.mxu1 %v82_v62  ;;  %390 = vmatmul.f32.vlgmr.msrb.gmra.mxu2 %v1546_v0  ;;  %v478_v60 = vld [vmem:[%s2819_s3 + $0x30] sm:$0xff]  ;;  %v589_v62 = vld [vmem:[%s2819_s3 + $0x3a8] sm:$0xff] }
  0x45   :  { %408 = vmatpush.msra.mxu0 %v141_v63  ;;  %768 = vmatpush.msra.mxu2 %v565_v1  ;;  %v611_v63 = vld [vmem:[%s2819_s3 + $0x458] sm:$0xff] }
  0x46   :  { %423 = vmatpush.msra.mxu1 %v76_v2  ;;  %749 = vmatpush.msrb.mxu3 %v514_v3  ;;  %v475_v1 = vld [vmem:[%s2819_s3 + $0x18] sm:$0xff]  ;;  %v634_v2 = vld [vmem:[%s2819_s3 + $0x510] sm:$0xff] }
  0x47   :  { %409 = vmatpush.msra.mxu0 %v135_v4  ;;  %769 = vmatpush.msra.mxu2 %v562_v5  ;;  %v586_v3 = vld [vmem:[%s2819_s3 + $0x390] sm:$0xff]  ;;  %v608_v4 = vld [vmem:[%s2819_s3 + $0x440] sm:$0xff] }
  0x48   :  { %424 = vmatpush.msra.mxu1 %v70_v6  ;;  %750 = vmatpush.msrb.mxu3 %v511_v12  ;;  %v472_v5 = vld [vmem:[%s2819_s3] sm:$0xff]  ;;  %v631_v6 = vld [vmem:[%s2819_s3 + $0x4f8] sm:$0xff]  ;;  %v602_v12 = vld [vmem:[%s2819_s3 + $0x410] sm:$0xff] }
  0x49   :  { %1288 = vmatpush.msk.msrb.mxu0 %vm195_vm0, %v172_v7  ;;  %770 = vmatpush.msra.mxu2 %v559_v8  ;;  %v583_v7 = vld [vmem:[%s2819_s3 + $0x378] sm:$0xff]  ;;  %v605_v8 = vld [vmem:[%s2819_s3 + $0x428] sm:$0xff] }
  0x4a   :  { %1287 = vmatmul.msk.f32.vlgmr.msra.gmra.mxu0 %vm192_vm1, %v1512_v53  ;;  %425 = vmatpush.msra.mxu1 %v64_v9  ;;  %v709_v9 = vld [vmem:[%s2819_s3 + $0x768] sm:$0xff] }
  0x4b   :  { %444 = vmatpush.msrb.mxu0 %v166_v10  ;;  %771 = vmatpush.msra.mxu2 %v556_v11  ;;  %v628_v10 = vld [vmem:[%s2819_s3 + $0x4e0] sm:$0xff] }
  0x4c   :  { %426 = vmatpush.msra.mxu1 %v58_v13  ;;  %751 = vmatpush.msrb.mxu3 %v508_v16  ;;  %v580_v11 = vld [vmem:[%s2819_s3 + $0x360] sm:$0xff]  ;;  %v706_v13 = vld [vmem:[%s2819_s3 + $0x750] sm:$0xff]  ;;  %v599_v16 = vld [vmem:[%s2819_s3 + $0x3f8] sm:$0xff] }
  0x4d   :  { %445 = vmatpush.msrb.mxu0 %v160_v14  ;;  %772 = vmatpush.msra.mxu2 %v553_v15  ;;  %v625_v14 = vld [vmem:[%s2819_s3 + $0x4c8] sm:$0xff] }
  0x4e   :  { %427 = vmatpush.msra.mxu1 %v52_v17  ;;  %752 = vmatpush.msrb.mxu3 %v505_v20  ;;  %v577_v15 = vld [vmem:[%s2819_s3 + $0x348] sm:$0xff]  ;;  %v703_v17 = vld [vmem:[%s2819_s3 + $0x738] sm:$0xff]  ;;  %v596_v20 = vld [vmem:[%s2819_s3 + $0x3e0] sm:$0xff] }
  0x4f   :  { %446 = vmatpush.msrb.mxu0 %v154_v18  ;;  %773 = vmatpush.msra.mxu2 %v550_v19  ;;  %v622_v18 = vld [vmem:[%s2819_s3 + $0x4b0] sm:$0xff] }
  0x50   :  { %428 = vmatpush.msra.mxu1 %v46_v21  ;;  %753 = vmatpush.msrb.mxu3 %v502_v24  ;;  %v574_v19 = vld [vmem:[%s2819_s3 + $0x330] sm:$0xff]  ;;  %v571_v21 = vld [vmem:[%s2819_s3 + $0x318] sm:$0xff] }
  0x51   :  { %447 = vmatpush.msrb.mxu0 %v148_v22  ;;  %774 = vmatpush.msra.mxu2 %v547_v23  ;;  %v593_v22 = vld [vmem:[%s2819_s3 + $0x3c8] sm:$0xff]  ;;  %v568_v23 = vld [vmem:[%s2819_s3 + $0x300] sm:$0xff]  ;;  %v590_v24 = vld [vmem:[%s2819_s3 + $0x3b0] sm:$0xff] }
  0x52   :  { %429 = vmatpush.msra.mxu1 %v40_v25  ;;  %754 = vmatpush.msrb.mxu3 %v499_v32  ;;  %v518_v25 = vld [vmem:[%s2819_s3 + $0x170] sm:$0xff]  ;;  %v503_v32 = vld [vmem:[%s2819_s3 + $0xf8] sm:$0xff] }
  0x53   :  { %448 = vmatpush.msrb.mxu0 %v142_v26  ;;  %430 = vmatmul.f32.vlgmr.msra.gmra.mxu1 %v1546_v0  ;;  %v610_v0 = vld [vmem:[%s2819_s3 + $0x450] sm:$0xff]  ;;  %v587_v26 = vld [vmem:[%s2819_s3 + $0x398] sm:$0xff] }
  0x54   :  { %775 = vmatpush.msra.mxu2 %v544_v27  ;;  %808 = vmatpush.msrb.mxu1 %v661_v29  ;;  %v515_v27 = vld [vmem:[%s2819_s3 + $0x158] sm:$0xff]  ;;  %v512_v29 = vld [vmem:[%s2819_s3 + $0x140] sm:$0xff] }
  0x55   :  { %449 = vmatpush.msrb.mxu0 %v136_v28  ;;  %755 = vmatpush.msrb.mxu3 %v496_v35  ;;  %v584_v28 = vld [vmem:[%s2819_s3 + $0x380] sm:$0xff]  ;;  %v581_v35 = vld [vmem:[%s2819_s3 + $0x368] sm:$0xff] }
  0x56   :  { %1289 = vmatmul.msk.f32.vlgmr.msrb.gmra.mxu0 %vm192_vm1, %v1512_v53  ;;  %776 = vmatpush.msra.mxu2 %v541_v30  ;;  %v607_v53 = vld [vmem:[%s2819_s3 + $0x438] sm:$0xff]  ;;  %v509_v30 = vld [vmem:[%s2819_s3 + $0x128] sm:$0xff] }
  0x57   :  { %788 = vmatpush.msra.mxu0 %v613_v31  ;;  %809 = vmatpush.msrb.mxu1 %v658_v34  ;;  %v506_v31 = vld [vmem:[%s2819_s3 + $0x110] sm:$0xff]  ;;  %v497_v34 = vld [vmem:[%s2819_s3 + $0xc8] sm:$0xff] }
  0x58   :  { %777 = vmatpush.msra.mxu2 %v538_v33  ;;  %756 = vmatpush.msrb.mxu3 %v493_v38  ;;  %v500_v33 = vld [vmem:[%s2819_s3 + $0xe0] sm:$0xff]  ;;  %v578_v38 = vld [vmem:[%s2819_s3 + $0x350] sm:$0xff] }
  0x59   :  { %789 = vmatpush.msra.mxu0 %v610_v0  ;;  %810 = vmatpush.msrb.mxu1 %v655_v37  ;;  %v700_v0 = vld [vmem:[%s2819_s3 + $0x720] sm:$0xff]  ;;  %v494_v37 = vld [vmem:[%s2819_s3 + $0xb0] sm:$0xff] }
  0x5a   :  { %778 = vmatpush.msra.mxu2 %v535_v36  ;;  %757 = vmatpush.msrb.mxu3 %v490_v42  ;;  %v619_v36 = vld [vmem:[%s2819_s3 + $0x498] sm:$0xff]  ;;  %v566_v42 = vld [vmem:[%s2819_s3 + $0x2f0] sm:$0xff] }
  0x5b   :  { %790 = vmatpush.msra.mxu0 %v607_v53  ;;  %811 = vmatpush.msrb.mxu1 %v652_v40  ;;  %v697_v53 = vld [vmem:[%s2819_s3 + $0x708] sm:$0xff]  ;;  %v491_v40 = vld [vmem:[%s2819_s3 + $0x98] sm:$0xff] }
  0x5c   :  { %779 = vmatpush.msra.mxu2 %v532_v39  ;;  %758 = vmatpush.msrb.mxu3 %v487_v46  ;;  %v616_v39 = vld [vmem:[%s2819_s3 + $0x480] sm:$0xff]  ;;  %v563_v46 = vld [vmem:[%s2819_s3 + $0x2d8] sm:$0xff] }
  0x5d   :  { %791 = vmatpush.msra.mxu0 %v604_v41  ;;  %812 = vmatpush.msrb.mxu1 %v649_v44  ;;  %v694_v41 = vld [vmem:[%s2819_s3 + $0x6f0] sm:$0xff]  ;;  %v488_v44 = vld [vmem:[%s2819_s3 + $0x80] sm:$0xff] }
  0x5e   :  { %780 = vmatpush.msra.mxu2 %v529_v43  ;;  %759 = vmatpush.msrb.mxu3 %v484_v50  ;;  %v575_v43 = vld [vmem:[%s2819_s3 + $0x338] sm:$0xff]  ;;  %v560_v50 = vld [vmem:[%s2819_s3 + $0x2c0] sm:$0xff] }
  0x5f   :  { %792 = vmatpush.msra.mxu0 %v601_v45  ;;  %813 = vmatpush.msrb.mxu1 %v646_v48  ;;  %v691_v45 = vld [vmem:[%s2819_s3 + $0x6d8] sm:$0xff]  ;;  %v485_v48 = vld [vmem:[%s2819_s3 + $0x68] sm:$0xff] }
  0x60   :  { %781 = vmatpush.msra.mxu2 %v526_v47  ;;  %760 = vmatpush.msrb.mxu3 %v481_v55  ;;  %v572_v47 = vld [vmem:[%s2819_s3 + $0x320] sm:$0xff]  ;;  %v557_v55 = vld [vmem:[%s2819_s3 + $0x2a8] sm:$0xff] }
  0x61   :  { %793 = vmatpush.msra.mxu0 %v598_v49  ;;  %814 = vmatpush.msrb.mxu1 %v643_v52  ;;  %v688_v49 = vld [vmem:[%s2819_s3 + $0x6c0] sm:$0xff]  ;;  %v482_v52 = vld [vmem:[%s2819_s3 + $0x50] sm:$0xff] }
  0x62   :  { %782 = vmatpush.msra.mxu2 %v523_v51  ;;  %761 = vmatpush.msrb.mxu3 %v478_v60  ;;  %v569_v51 = vld [vmem:[%s2819_s3 + $0x308] sm:$0xff]  ;;  %v679_v60 = vld [vmem:[%s2819_s3 + $0x678] sm:$0xff] }
  0x63   :  { %794 = vmatpush.msra.mxu0 %v595_v54  ;;  %815 = vmatpush.msrb.mxu1 %v640_v57  ;;  %v685_v54 = vld [vmem:[%s2819_s3 + $0x6a8] sm:$0xff]  ;;  %v682_v57 = vld [vmem:[%s2819_s3 + $0x690] sm:$0xff] }
  0x64   :  { %783 = vmatpush.msra.mxu2 %v520_v56  ;;  %762 = vmatpush.msrb.mxu3 %v475_v1  ;;  %v479_v56 = vld [vmem:[%s2819_s3 + $0x38] sm:$0xff]  ;;  %v548_v1 = vld [vmem:[%s2819_s3 + $0x260] sm:$0xff] }
  0x65   :  { %795 = vmatpush.msra.mxu0 %v592_v58  ;;  %816 = vmatpush.msrb.mxu1 %v637_v61  ;;  %v554_v58 = vld [vmem:[%s2819_s3 + $0x290] sm:$0xff]  ;;  %v551_v61 = vld [vmem:[%s2819_s3 + $0x278] sm:$0xff] }
  0x66   :  { %908 = vmatpush.msrb.mxu2 %v614_v59  ;;  %763 = vmatpush.msrb.mxu3 %v472_v5  ;;  %v476_v59 = vld [vmem:[%s2819_s3 + $0x20] sm:$0xff]  ;;  %v542_v5 = vld [vmem:[%s2819_s3 + $0x230] sm:$0xff] }
  0x67   :  { %796 = vmatpush.msra.mxu0 %v589_v62  ;;  %817 = vmatpush.msrb.mxu1 %v634_v2  ;;  %v473_v62 = vld [vmem:[%s2819_s3 + $0x8] sm:$0xff] }
  0x68   :  { %909 = vmatpush.msrb.mxu2 %v611_v63  ;;  %828 = vmatpush.msra.mxu3 %v709_v9  ;;  %v676_v63 = vld [vmem:[%s2819_s3 + $0x660] sm:$0xff]  ;;  %v673_v2 = vld [vmem:[%s2819_s3 + $0x648] sm:$0xff] }
  0x69   :  { %797 = vmatpush.msra.mxu0 %v586_v3  ;;  %818 = vmatpush.msrb.mxu1 %v631_v6  ;;  %v545_v3 = vld [vmem:[%s2819_s3 + $0x248] sm:$0xff]  ;;  %v667_v6 = vld [vmem:[%s2819_s3 + $0x618] sm:$0xff]  ;;  %v536_v9 = vld [vmem:[%s2819_s3 + $0x200] sm:$0xff] }
  0x6a   :  { %910 = vmatpush.msrb.mxu2 %v608_v4  ;;  %829 = vmatpush.msra.mxu3 %v706_v13  ;;  %v670_v4 = vld [vmem:[%s2819_s3 + $0x630] sm:$0xff] }
  0x6b   :  { %798 = vmatpush.msra.mxu0 %v583_v7  ;;  %819 = vmatpush.msrb.mxu1 %v628_v10  ;;  %v539_v7 = vld [vmem:[%s2819_s3 + $0x218] sm:$0xff]  ;;  %v2167_v10 = vld [vmem:[%s2820_s2] sm:$0x3f]  ;;  %v530_v13 = vld [vmem:[%s2819_s3 + $0x1d0] sm:$0xff] }
  0x6c   :  { %911 = vmatpush.msrb.mxu2 %v605_v8  ;;  %830 = vmatpush.msra.mxu3 %v703_v17  ;;  %v664_v8 = vld [vmem:[%s2819_s3 + $0x600] sm:$0xff]  ;;  %v527_v17 = vld [vmem:[%s2819_s3 + $0x1b8] sm:$0xff] }
  0x6d   :  { %799 = vmatpush.msra.mxu0 %v580_v11  ;;  %820 = vmatpush.msrb.mxu1 %v625_v14  ;;  %v533_v11 = vld [vmem:[%s2819_s3 + $0x1e8] sm:$0xff] }
  0x6e   :  { %912 = vmatpush.msrb.mxu2 %v602_v12  ;;  %831 = vmatpush.msra.mxu3 %v700_v0  ;;  %v176_v12 = vperm.slane %v2167_v10, 1  ;;  %v507_v0 = vld [vmem:[%s2819_s3 + $0x118] sm:$0xff] }
  0x6f   :  { %800 = vmatpush.msra.mxu0 %v577_v15  ;;  %821 = vmatpush.msrb.mxu1 %v622_v18 }
  0x70   :  { %913 = vmatpush.msrb.mxu2 %v599_v16  ;;  %832 = vmatpush.msra.mxu3 %v697_v53  ;;  %v504_v53 = vld [vmem:[%s2819_s3 + $0x100] sm:$0xff] }
  0x71   :  { %801 = vmatpush.msra.mxu0 %v574_v19  ;;  %822 = vmatpush.msrb.mxu1 %v619_v36  ;;  %v524_v19 = vld [vmem:[%s2819_s3 + $0x1a0] sm:$0xff] }
  0x72   :  { %914 = vmatpush.msrb.mxu2 %v596_v20  ;;  %833 = vmatpush.msra.mxu3 %v694_v41 }
  0x73   :  { %802 = vmatpush.msra.mxu0 %v571_v21  ;;  %823 = vmatpush.msrb.mxu1 %v616_v39  ;;  %v521_v21 = vld [vmem:[%s2819_s3 + $0x188] sm:$0xff]  ;;  %v707_v39 = vld [vmem:[%s2819_s3 + $0x758] sm:$0xff] }
  0x74   :  { %915 = vmatpush.msrb.mxu2 %v593_v22  ;;  %834 = vmatpush.msra.mxu3 %v691_v45  ;;  %v701_v45 = vld [vmem:[%s2819_s3 + $0x728] sm:$0xff] }
  0x75   :  { %803 = vmatpush.msra.mxu0 %v568_v23  ;;  %888 = vmatpush.msra.mxu1 %v566_v42  ;;  %v177_v23 = vperm.slane %v2167_v10, 2  ;;  %v704_v42 = vld [vmem:[%s2819_s3 + $0x740] sm:$0xff] }
  0x76   :  { %916 = vmatpush.msrb.mxu2 %v590_v24  ;;  %835 = vmatpush.msra.mxu3 %v688_v49  ;;  %v519_v24 = vld [vmem:[%s2819_s3 + $0x178] sm:$0xff] }
  0x77   :  { %868 = vmatpush.msrb.mxu0 %v518_v25  ;;  %889 = vmatpush.msra.mxu1 %v563_v46  ;;  %v733_v46 = vld [vmem:[%s2819_s3 + $0x828] sm:$0xff]  ;;  %v495_v49 = vld [vmem:[%s2819_s3 + $0xb8] sm:$0xff] }
  0x78   :  { %917 = vmatpush.msrb.mxu2 %v587_v26  ;;  %836 = vmatpush.msra.mxu3 %v685_v54  ;;  %v516_v26 = vld [vmem:[%s2819_s3 + $0x160] sm:$0xff] }
  0x79   :  { %869 = vmatpush.msrb.mxu0 %v515_v27  ;;  %890 = vmatpush.msra.mxu1 %v560_v50  ;;  %v730_v50 = vld [vmem:[%s2819_s3 + $0x810] sm:$0xff]  ;;  %v492_v54 = vld [vmem:[%s2819_s3 + $0xa0] sm:$0xff] }
  0x7a   :  { %918 = vmatpush.msrb.mxu2 %v584_v28  ;;  %837 = vmatpush.msra.mxu3 %v682_v57  ;;  %v692_v57 = vld [vmem:[%s2819_s3 + $0x6e0] sm:$0xff] }
  0x7b   :  { %870 = vmatpush.msrb.mxu0 %v512_v29  ;;  %891 = vmatpush.msra.mxu1 %v557_v55  ;;  %v178_v55 = vperm.slane %v2167_v10, 3 }
  0x7c   :  { %919 = vmatpush.msrb.mxu2 %v581_v35  ;;  %838 = vmatpush.msra.mxu3 %v679_v60  ;;  %v710_v35 = vld [vmem:[%s2819_s3 + $0x770] sm:$0xff] }
  0x7d   :  { %871 = vmatpush.msrb.mxu0 %v509_v30  ;;  %892 = vmatpush.msra.mxu1 %v554_v58  ;;  %v513_v30 = vld [vmem:[%s2819_s3 + $0x148] sm:$0xff] }
  0x7e   :  { %920 = vmatpush.msrb.mxu2 %v578_v38  ;;  %839 = vmatpush.msra.mxu3 %v676_v63  ;;  %v489_v58 = vld [vmem:[%s2819_s3 + $0x88] sm:$0xff] }
  0x7f   :  { %872 = vmatpush.msrb.mxu0 %v506_v31  ;;  %893 = vmatpush.msra.mxu1 %v551_v61  ;;  %v689_v61 = vld [vmem:[%s2819_s3 + $0x6c8] sm:$0xff] }
  0x80   :  { %921 = vmatpush.msrb.mxu2 %v575_v43  ;;  %840 = vmatpush.msra.mxu3 %v673_v2  ;;  %v498_v43 = vld [vmem:[%s2819_s3 + $0xd0] sm:$0xff]  ;;  %v179_v2 = vperm.slane %v2167_v10, 4 }
  0x81   :  { %873 = vmatpush.msrb.mxu0 %v503_v32  ;;  %894 = vmatpush.msra.mxu1 %v548_v1  ;;  %v510_v32 = vld [vmem:[%s2819_s3 + $0x130] sm:$0xff]  ;;  %v721_v1 = vld [vmem:[%s2819_s3 + $0x7c8] sm:$0xff] }
  0x82   :  { %922 = vmatpush.msrb.mxu2 %v572_v47  ;;  %841 = vmatpush.msra.mxu3 %v670_v4  ;;  %v483_v4 = vld [vmem:[%s2819_s3 + $0x58] sm:$0xff] }
  0x83   :  { %874 = vmatpush.msrb.mxu0 %v500_v33  ;;  %895 = vmatpush.msra.mxu1 %v545_v3  ;;  %v175_v33 = vperm.slane %v2167_v10, 0  ;;  %v686_v3 = vld [vmem:[%s2819_s3 + $0x6b0] sm:$0xff] }
  0x84   :  { %923 = vmatpush.msrb.mxu2 %v569_v51  ;;  %842 = vmatpush.msra.mxu3 %v667_v6  ;;  %v718_v6 = vld [vmem:[%s2819_s3 + $0x7b0] sm:$0xff] }
  0x85   :  { %875 = vmatpush.msrb.mxu0 %v497_v34  ;;  %896 = vmatpush.msra.mxu1 %v542_v5 }
  0x86   :  { %843 = vmatpush.msra.mxu3 %v664_v8  ;;  %v480_v8 = vld [vmem:[%s2819_s3 + $0x40] sm:$0xff] }
  0x87   :  { %876 = vmatpush.msrb.mxu0 %v494_v37  ;;  %897 = vmatpush.msra.mxu1 %v539_v7  ;;  %v683_v7 = vld [vmem:[%s2819_s3 + $0x698] sm:$0xff] }
  0x89   :  { %877 = vmatpush.msrb.mxu0 %v491_v40  ;;  %898 = vmatpush.msra.mxu1 %v536_v9  ;;  %v501_v40 = vld [vmem:[%s2819_s3 + $0xe8] sm:$0xff] }
  0x8b   :  { %878 = vmatpush.msrb.mxu0 %v488_v44  ;;  %899 = vmatpush.msra.mxu1 %v533_v11 }
  0x8d   :  { %879 = vmatpush.msrb.mxu0 %v485_v48  ;;  %900 = vmatpush.msra.mxu1 %v530_v13  ;;  %v698_v48 = vld [vmem:[%s2819_s3 + $0x710] sm:$0xff]  ;;  %v715_v13 = vld [vmem:[%s2819_s3 + $0x798] sm:$0xff] }
  0x8f   :  { %880 = vmatpush.msrb.mxu0 %v482_v52  ;;  %901 = vmatpush.msra.mxu1 %v527_v17  ;;  %v695_v52 = vld [vmem:[%s2819_s3 + $0x6f8] sm:$0xff] }
  0x91   :  { %881 = vmatpush.msrb.mxu0 %v479_v56  ;;  %902 = vmatpush.msra.mxu1 %v524_v19  ;;  %v727_v56 = vld [vmem:[%s2819_s3 + $0x7f8] sm:$0xff]  ;;  %v712_v19 = vld [vmem:[%s2819_s3 + $0x780] sm:$0xff] }
  0x93   :  { %882 = vmatpush.msrb.mxu0 %v476_v59  ;;  %903 = vmatpush.msra.mxu1 %v521_v21  ;;  %v724_v59 = vld [vmem:[%s2819_s3 + $0x7e0] sm:$0xff]  ;;  %v731_v21 = vld [vmem:[%s2819_s3 + $0x818] sm:$0xff] }
  0x95   :  { %883 = vmatpush.msrb.mxu0 %v473_v62  ;;  %v486_v62 = vld [vmem:[%s2819_s3 + $0x70] sm:$0xff] }
  0xa1   :  { %v291_v14 = vpop.f32.mrf.mxu3 }
  0xa5   :  { %v251_v15 = vpop.f32.mrf.mxu1  ;;  %v271_v16 = vpop.f32.mrf.mxu2 }
  0xa6   :  { %v272_v18 = vadd.f32 %v271_v16, %v176_v12  ;;  %v680_v16 = vld [vmem:[%s2819_s3 + $0x680] sm:$0xff] }
  0xa8   :  { %v292_v20 = vadd.f32 %v291_v14, %v272_v18  ;;  %v477_v18 = vld [vmem:[%s2819_s3 + $0x28] sm:$0xff] }
  0xaa   :  { %vm455_vm2 = vcmp.ge.f32.partialorder %v292_v20, 0.0  ;;  %v461_v22 = vmul.f32 0.2, %v292_v20 }
  0xac   :  { %v2189_v25 = vsel %vm455_vm2, %v292_v20, %v461_v22  ;;  %v677_v22 = vld [vmem:[%s2819_s3 + $0x668] sm:$0xff] }
  0xad   :  { %784 = vmatmul.f32.vlgmr.msra.gmra.mxu2 %v2189_v25 }
  0xae   :  { %v311_v27 = vpop.f32.mrf.mxu1  ;;  %988 = vmatpush.msra.mxu2 %v519_v24 }
  0xaf   :  { %v312_v28 = vadd.f32 %v311_v27, %v177_v23  ;;  %v331_v29 = vpop.f32.mrf.mxu3  ;;  %v474_v23 = vld [vmem:[%s2819_s3 + $0x10] sm:$0xff]  ;;  %v180_v27 = vperm.slane %v2167_v10, 5  ;;  %v711_v10 = vld [vmem:[%s2819_s3 + $0x778] sm:$0xff] }
  0xb0   :  { %989 = vmatpush.msra.mxu2 %v516_v26  ;;  %v728_v26 = vld [vmem:[%s2819_s3 + $0x800] sm:$0xff] }
  0xb1   :  { %v332_v31 = vadd.f32 %v331_v29, %v312_v28  ;;  %v662_v28 = vld [vmem:[%s2819_s3 + $0x5f0] sm:$0xff] }
  0xb2   :  { %990 = vmatpush.msra.mxu2 %v513_v30  ;;  %v674_v29 = vld [vmem:[%s2819_s3 + $0x650] sm:$0xff] }
  0xb3   :  { %vm456_vm3 = vcmp.ge.f32.partialorder %v332_v31, 0.0  ;;  %v462_v34 = vmul.f32 0.2, %v332_v31 }
  0xb4   :  { %991 = vmatpush.msra.mxu2 %v510_v32  ;;  %v659_v32 = vld [vmem:[%s2819_s3 + $0x5d8] sm:$0xff] }
  0xb5   :  { %v231_v36 = vpop.f32.mrf.mxu0  ;;  %v2208_v37 = vsel %vm456_vm3, %v332_v31, %v462_v34  ;;  %v725_v31 = vld [vmem:[%s2819_s3 + $0x7e8] sm:$0xff]  ;;  %v671_v34 = vld [vmem:[%s2819_s3 + $0x638] sm:$0xff] }
  0xb6   :  { %v232_v38 = vadd.f32 %v231_v36, %v175_v33  ;;  %804 = vmatmul.f32.vlgmr.msra.gmra.mxu0 %v2208_v37  ;;  %992 = vmatpush.msra.mxu2 %v507_v0  ;;  %v722_v36 = vld [vmem:[%s2819_s3 + $0x7d0] sm:$0xff] }
  0xb7   :  { %948 = vmatpush.msra.mxu0 %v710_v35  ;;  %924 = vmatmul.f32.vlgmr.msrb.gmra.mxu2 %v2208_v37  ;;  %v708_v35 = vld [vmem:[%s2819_s3 + $0x760] sm:$0xff] }
  0xb8   :  { %v252_v41 = vadd.f32 %v251_v15, %v232_v38  ;;  %993 = vmatpush.msra.mxu2 %v504_v53  ;;  %v734_v15 = vld [vmem:[%s2819_s3 + $0x830] sm:$0xff]  ;;  %v656_v38 = vld [vmem:[%s2819_s3 + $0x5c0] sm:$0xff] }
  0xb9   :  { %949 = vmatpush.msra.mxu0 %v707_v39  ;;  %v668_v39 = vld [vmem:[%s2819_s3 + $0x620] sm:$0xff] }
  0xba   :  { %v460_v44 = vmul.f32 0.2, %v252_v41  ;;  %994 = vmatpush.msra.mxu2 %v501_v40  ;;  %vm454_vm4 = vcmp.ge.f32.partialorder %v252_v41, 0.0 }
  0xbb   :  { %950 = vmatpush.msra.mxu0 %v704_v42  ;;  %v719_v42 = vld [vmem:[%s2819_s3 + $0x7b8] sm:$0xff] }
  0xbc   :  { %v2233_v47 = vsel %vm454_vm4, %v252_v41, %v460_v44  ;;  %995 = vmatpush.msra.mxu2 %v498_v43  ;;  %v705_v41 = vld [vmem:[%s2819_s3 + $0x748] sm:$0xff] }
  0xbd   :  { %951 = vmatpush.msra.mxu0 %v701_v45  ;;  %764 = vmatmul.f32.vlgmr.msrb.gmra.mxu3 %v2233_v47  ;;  %v653_v43 = vld [vmem:[%s2819_s3 + $0x5a8] sm:$0xff] }
  0xbe   :  { %884 = vmatmul.f32.vlgmr.msrb.gmra.mxu0 %v2233_v47  ;;  %856 = vmatpush.msrb.mxu3 %v733_v46  ;;  %v665_v44 = vld [vmem:[%s2819_s3 + $0x608] sm:$0xff]  ;;  %v702_v46 = vld [vmem:[%s2819_s3 + $0x730] sm:$0xff] }
  0xbf   :  { %v371_v51 = vpop.f32.mrf.mxu0  ;;  %952 = vmatpush.msra.mxu0 %v698_v48  ;;  %996 = vmatpush.msra.mxu2 %v495_v49  ;;  %v663_v48 = vld [vmem:[%s2819_s3 + $0x5f8] sm:$0xff] }
  0xc0   :  { %857 = vmatpush.msrb.mxu3 %v730_v50  ;;  %v699_v50 = vld [vmem:[%s2819_s3 + $0x718] sm:$0xff] }
  0xc1   :  { %953 = vmatpush.msra.mxu0 %v695_v52  ;;  %997 = vmatpush.msra.mxu2 %v492_v54  ;;  %v713_v52 = vld [vmem:[%s2819_s3 + $0x788] sm:$0xff]  ;;  %v660_v54 = vld [vmem:[%s2819_s3 + $0x5e0] sm:$0xff] }
  0xc2   :  { %v351_v60 = vpop.f32.mrf.mxu3  ;;  %858 = vmatpush.msrb.mxu3 %v727_v56  ;;  %v647_v56 = vld [vmem:[%s2819_s3 + $0x578] sm:$0xff] }
  0xc3   :  { %v352_v63 = vadd.f32 %v351_v60, %v178_v55  ;;  %954 = vmatpush.msra.mxu0 %v692_v57  ;;  %998 = vmatpush.msra.mxu2 %v489_v58  ;;  %v615_v55 = vld [vmem:[%s2819_s3 + $0x478] sm:$0xff]  ;;  %v696_v57 = vld [vmem:[%s2819_s3 + $0x700] sm:$0xff]  ;;  %v657_v58 = vld [vmem:[%s2819_s3 + $0x5c8] sm:$0xff] }
  0xc4   :  { %859 = vmatpush.msrb.mxu3 %v724_v59  ;;  %v612_v59 = vld [vmem:[%s2819_s3 + $0x460] sm:$0xff] }
  0xc5   :  { %v372_v5 = vadd.f32 %v371_v51, %v352_v63  ;;  %955 = vmatpush.msra.mxu0 %v689_v61  ;;  %999 = vmatpush.msra.mxu2 %v486_v62  ;;  %v650_v51 = vld [vmem:[%s2819_s3 + $0x590] sm:$0xff]  ;;  %v644_v60 = vld [vmem:[%s2819_s3 + $0x560] sm:$0xff]  ;;  %v693_v61 = vld [vmem:[%s2819_s3 + $0x6e8] sm:$0xff] }
  0xc6   :  { %860 = vmatpush.msrb.mxu3 %v721_v1  ;;  %v654_v62 = vld [vmem:[%s2819_s3 + $0x5b0] sm:$0xff]  ;;  %v609_v63 = vld [vmem:[%s2819_s3 + $0x448] sm:$0xff] }
  0xc7   :  { %v463_v9 = vmul.f32 0.2, %v372_v5  ;;  %v391_v11 = vpop.f32.mrf.mxu2  ;;  %956 = vmatpush.msra.mxu0 %v686_v3  ;;  %1000 = vmatpush.msra.mxu2 %v483_v4  ;;  %v411_v12 = vpop.f32.mrf.mxu0  ;;  %vm457_vm5 = vcmp.ge.f32.partialorder %v372_v5, 0.0  ;;  %v641_v1 = vld [vmem:[%s2819_s3 + $0x548] sm:$0xff]  ;;  %v651_v3 = vld [vmem:[%s2819_s3 + $0x598] sm:$0xff]  ;;  %v606_v4 = vld [vmem:[%s2819_s3 + $0x430] sm:$0xff] }
  0xc8   :  { %v392_v14 = vadd.f32 %v391_v11, %v179_v2  ;;  %861 = vmatpush.msrb.mxu3 %v718_v6  ;;  %v690_v2 = vld [vmem:[%s2819_s3 + $0x6d0] sm:$0xff]  ;;  %v687_v6 = vld [vmem:[%s2819_s3 + $0x6b8] sm:$0xff]  ;;  %v684_v11 = vld [vmem:[%s2819_s3 + $0x6a0] sm:$0xff] }
  0xc9   :  { %957 = vmatpush.msra.mxu0 %v683_v7  ;;  %v2299_v17 = vsel %vm457_vm5, %v372_v5, %v463_v9  ;;  %1001 = vmatpush.msra.mxu2 %v480_v8  ;;  %v638_v5 = vld [vmem:[%s2819_s3 + $0x530] sm:$0xff]  ;;  %v648_v7 = vld [vmem:[%s2819_s3 + $0x580] sm:$0xff]  ;;  %v603_v8 = vld [vmem:[%s2819_s3 + $0x418] sm:$0xff] }
  0xca   :  { %v412_v20 = vadd.f32 %v411_v12, %v392_v14  ;;  %824 = vmatmul.f32.vlgmr.msrb.gmra.mxu1 %v2299_v17  ;;  %862 = vmatpush.msrb.mxu3 %v715_v13  ;;  %v635_v9 = vld [vmem:[%s2819_s3 + $0x518] sm:$0xff]  ;;  %v645_v12 = vld [vmem:[%s2819_s3 + $0x568] sm:$0xff]  ;;  %v600_v13 = vld [vmem:[%s2819_s3 + $0x400] sm:$0xff] }
  0xcb   :  { %976 = vmatpush.msrb.mxu1 %v734_v15  ;;  %958 = vmatpush.msra.mxu0 %v680_v16  ;;  %v632_v14 = vld [vmem:[%s2819_s3 + $0x500] sm:$0xff]  ;;  %v681_v15 = vld [vmem:[%s2819_s3 + $0x688] sm:$0xff]  ;;  %v642_v16 = vld [vmem:[%s2819_s3 + $0x550] sm:$0xff] }
  0xcc   :  { %vm458_vm6 = vcmp.ge.f32.partialorder %v412_v20, 0.0  ;;  %v464_v24 = vmul.f32 0.2, %v412_v20  ;;  %1002 = vmatpush.msra.mxu2 %v477_v18  ;;  %863 = vmatpush.msrb.mxu3 %v712_v19  ;;  %v597_v18 = vld [vmem:[%s2819_s3 + $0x3e8] sm:$0xff] }
  0xcd   :  { %977 = vmatpush.msrb.mxu1 %v731_v21  ;;  %959 = vmatpush.msra.mxu0 %v677_v22  ;;  %v629_v19 = vld [vmem:[%s2819_s3 + $0x4e8] sm:$0xff]  ;;  %v639_v21 = vld [vmem:[%s2819_s3 + $0x538] sm:$0xff]  ;;  %v594_v22 = vld [vmem:[%s2819_s3 + $0x3d0] sm:$0xff] }
  0xce   :  { %1003 = vmatpush.msra.mxu2 %v474_v23  ;;  %v2327_v30 = vsel %vm458_vm6, %v412_v20, %v464_v24  ;;  %v678_v20 = vld [vmem:[%s2819_s3 + $0x670] sm:$0xff]  ;;  %v675_v24 = vld [vmem:[%s2819_s3 + $0x658] sm:$0xff] }
  0xcf   :  { %978 = vmatpush.msrb.mxu1 %v728_v26  ;;  %844 = vmatmul.f32.vlgmr.msra.gmra.mxu3 %v2327_v30  ;;  %v626_v23 = vld [vmem:[%s2819_s3 + $0x4d0] sm:$0xff]  ;;  %v636_v26 = vld [vmem:[%s2819_s3 + $0x520] sm:$0xff] }
  0xd0   :  { %v431_v33 = vpop.f32.mrf.mxu1  ;;  %928 = vmatpush.msra.mxu3 %v662_v28  ;;  %960 = vmatpush.msra.mxu0 %v674_v29  ;;  %v623_v28 = vld [vmem:[%s2819_s3 + $0x4b8] sm:$0xff]  ;;  %v672_v29 = vld [vmem:[%s2819_s3 + $0x640] sm:$0xff] }
  0xd1   :  { %v432_v0 = vadd.f32 %v431_v33, %v180_v27  ;;  %1004 = vmatmul.f32.vlgmr.msra.gmra.mxu2 %v2233_v47  ;;  %979 = vmatpush.msrb.mxu1 %v725_v31  ;;  %v716_v47 = vld [vmem:[%s2819_s3 + $0x7a0] sm:$0xff]  ;;  %v591_v27 = vld [vmem:[%s2819_s3 + $0x3b8] sm:$0xff]  ;;  %v633_v31 = vld [vmem:[%s2819_s3 + $0x508] sm:$0xff] }
  0xd2   :  { %1068 = vmatpush.msrb.mxu2 %v711_v10  ;;  %929 = vmatpush.msra.mxu3 %v659_v32  ;;  %v588_v10 = vld [vmem:[%s2819_s3 + $0x3a0] sm:$0xff]  ;;  %v669_v33 = vld [vmem:[%s2819_s3 + $0x628] sm:$0xff] }
  0xd3   :  { %v451_v53 = vpop.f32.mrf.mxu0  ;;  %961 = vmatpush.msra.mxu0 %v671_v34  ;;  %904 = vmatmul.f32.vlgmr.msra.gmra.mxu1 %v2189_v25  ;;  %v620_v32 = vld [vmem:[%s2819_s3 + $0x4a0] sm:$0xff]  ;;  %v630_v34 = vld [vmem:[%s2819_s3 + $0x4f0] sm:$0xff] }
  0xd4   :  { %v452_v40 = vadd.f32 %v451_v53, %v432_v0  ;;  %1069 = vmatpush.msrb.mxu2 %v708_v35  ;;  %980 = vmatpush.msrb.mxu1 %v722_v36  ;;  %v617_v0 = vld [vmem:[%s2819_s3 + $0x488] sm:$0xff]  ;;  %v666_v36 = vld [vmem:[%s2819_s3 + $0x610] sm:$0xff]  ;;  %v567_v53 = vld [vmem:[%s2819_s3 + $0x2f8] sm:$0xff] }
  0xd5   :  { %930 = vmatpush.msra.mxu3 %v656_v38  ;;  %962 = vmatpush.msra.mxu0 %v668_v39  ;;  %v585_v35 = vld [vmem:[%s2819_s3 + $0x388] sm:$0xff]  ;;  %v627_v38 = vld [vmem:[%s2819_s3 + $0x4d8] sm:$0xff]  ;;  %v582_v39 = vld [vmem:[%s2819_s3 + $0x370] sm:$0xff] }
  0xd6   :  { %vm459_vm7 = vcmp.ge.f32.partialorder %v452_v40, 0.0  ;;  %v465_v45 = vmul.f32 0.2, %v452_v40  ;;  %1070 = vmatpush.msrb.mxu2 %v705_v41  ;;  %981 = vmatpush.msrb.mxu1 %v719_v42  ;;  %v624_v41 = vld [vmem:[%s2819_s3 + $0x4c0] sm:$0xff]  ;;  %v579_v42 = vld [vmem:[%s2819_s3 + $0x358] sm:$0xff] }
  0xd7   :  { %931 = vmatpush.msra.mxu3 %v653_v43  ;;  %963 = vmatpush.msra.mxu0 %v665_v44  ;;  %v561_v43 = vld [vmem:[%s2819_s3 + $0x2c8] sm:$0xff] }
  0xd8   :  { %v2377_v49 = vsel %vm459_vm7, %v452_v40, %v465_v45  ;;  %1071 = vmatpush.msrb.mxu2 %v702_v46  ;;  %964 = vmatmul.f32.vlgmr.msra.gmra.mxu0 %v2327_v30  ;;  %v564_v40 = vld [vmem:[%s2819_s3 + $0x2e0] sm:$0xff]  ;;  %v621_v44 = vld [vmem:[%s2819_s3 + $0x4a8] sm:$0xff]  ;;  %v618_v46 = vld [vmem:[%s2819_s3 + $0x490] sm:$0xff] }
  0xd9   :  { %982 = vmatpush.msrb.mxu1 %v716_v47  ;;  %1048 = vmatpush.msrb.mxu0 %v663_v48  ;;  %v576_v45 = vld [vmem:[%s2819_s3 + $0x340] sm:$0xff]  ;;  %v573_v47 = vld [vmem:[%s2819_s3 + $0x328] sm:$0xff]  ;;  %v555_v48 = vld [vmem:[%s2819_s3 + $0x298] sm:$0xff] }
  0xda   :  { %1290 = vmatmul.msk.f32.vlgmr.msrb.gmra.mxu3 %vm744_vm8, %v2377_v49  ;;  %1072 = vmatpush.msrb.mxu2 %v699_v50  ;;  %v570_v50 = vld [vmem:[%s2819_s3 + $0x310] sm:$0xff] }
  0xdb   :  { %932 = vmatpush.msra.mxu3 %v650_v51  ;;  %983 = vmatpush.msrb.mxu1 %v713_v52  ;;  %v552_v51 = vld [vmem:[%s2819_s3 + $0x280] sm:$0xff]  ;;  %v549_v52 = vld [vmem:[%s2819_s3 + $0x268] sm:$0xff] }
  0xdc   :  { %1049 = vmatpush.msrb.mxu0 %v660_v54  ;;  %1073 = vmatpush.msrb.mxu2 %v696_v57  ;;  %v546_v54 = vld [vmem:[%s2819_s3 + $0x250] sm:$0xff]  ;;  %v531_v57 = vld [vmem:[%s2819_s3 + $0x1d8] sm:$0xff] }
  0xdd   :  { %1028 = vmatpush.msra.mxu1 %v615_v55  ;;  %933 = vmatpush.msra.mxu3 %v647_v56  ;;  %v540_v55 = vld [vmem:[%s2819_s3 + $0x220] sm:$0xff]  ;;  %v537_v56 = vld [vmem:[%s2819_s3 + $0x208] sm:$0xff] }
  0xde   :  { %1050 = vmatpush.msrb.mxu0 %v657_v58  ;;  %1074 = vmatpush.msrb.mxu2 %v693_v61  ;;  %v528_v58 = vld [vmem:[%s2819_s3 + $0x1c0] sm:$0xff]  ;;  %v735_v61 = vld [vmem:[%s2819_s3 + $0x838] sm:$0xff] }
  0xdf   :  { %1029 = vmatpush.msra.mxu1 %v612_v59  ;;  %934 = vmatpush.msra.mxu3 %v644_v60  ;;  %v525_v59 = vld [vmem:[%s2819_s3 + $0x1a8] sm:$0xff]  ;;  %v522_v60 = vld [vmem:[%s2819_s3 + $0x190] sm:$0xff] }
  0xe0   :  { %1051 = vmatpush.msrb.mxu0 %v654_v62  ;;  %1075 = vmatpush.msrb.mxu2 %v690_v2  ;;  %v732_v62 = vld [vmem:[%s2819_s3 + $0x820] sm:$0xff]  ;;  %v723_v2 = vld [vmem:[%s2819_s3 + $0x7d8] sm:$0xff] }
  0xe1   :  { %1030 = vmatpush.msra.mxu1 %v609_v63  ;;  %935 = vmatpush.msra.mxu3 %v641_v1  ;;  %v729_v63 = vld [vmem:[%s2819_s3 + $0x808] sm:$0xff]  ;;  %v726_v1 = vld [vmem:[%s2819_s3 + $0x7f0] sm:$0xff] }
  0xe2   :  { %1052 = vmatpush.msrb.mxu0 %v651_v3  ;;  %1076 = vmatpush.msrb.mxu2 %v687_v6  ;;  %v717_v3 = vld [vmem:[%s2819_s3 + $0x7a8] sm:$0xff]  ;;  %v1131_v6 = vld [vmem:[%s2821_s5 + $0x70] sm:$0xff] }
  0xe3   :  { %1031 = vmatpush.msra.mxu1 %v606_v4  ;;  %936 = vmatpush.msra.mxu3 %v638_v5  ;;  %v714_v4 = vld [vmem:[%s2819_s3 + $0x790] sm:$0xff]  ;;  %v1132_v5 = vld [vmem:[%s2821_s5 + $0x78] sm:$0xff] }
  0xe4   :  { %1053 = vmatpush.msrb.mxu0 %v648_v7  ;;  %1077 = vmatpush.msrb.mxu2 %v684_v11  ;;  %v1130_v7 = vld [vmem:[%s2821_s5 + $0x68] sm:$0xff] }
  0xe5   :  { %1032 = vmatpush.msra.mxu1 %v603_v8  ;;  %937 = vmatpush.msra.mxu3 %v635_v9  ;;  %v1129_v8 = vld [vmem:[%s2821_s5 + $0x60] sm:$0xff]  ;;  %v1128_v9 = vld [vmem:[%s2821_s5 + $0x58] sm:$0xff]  ;;  %v1126_v11 = vld [vmem:[%s2821_s5 + $0x48] sm:$0xff] }
  0xe6   :  { %1054 = vmatpush.msrb.mxu0 %v645_v12  ;;  %1078 = vmatpush.msrb.mxu2 %v681_v15  ;;  %v1125_v12 = vld [vmem:[%s2821_s5 + $0x40] sm:$0xff]  ;;  %v1122_v15 = vld [vmem:[%s2821_s5 + $0x28] sm:$0xff] }
  0xe7   :  { %1033 = vmatpush.msra.mxu1 %v600_v13  ;;  %938 = vmatpush.msra.mxu3 %v632_v14  ;;  %v1124_v13 = vld [vmem:[%s2821_s5 + $0x38] sm:$0xff]  ;;  %v1123_v14 = vld [vmem:[%s2821_s5 + $0x30] sm:$0xff] }
  0xe8   :  { %1055 = vmatpush.msrb.mxu0 %v642_v16  ;;  %1079 = vmatpush.msrb.mxu2 %v678_v20  ;;  %v1121_v16 = vld [vmem:[%s2821_s5 + $0x20] sm:$0xff]  ;;  %v1148_v20 = vld [vmem:[%s2821_s5 + $0xf8] sm:$0xff] }
  0xe9   :  { %1034 = vmatpush.msra.mxu1 %v597_v18  ;;  %939 = vmatpush.msra.mxu3 %v629_v19  ;;  %v1120_v18 = vld [vmem:[%s2821_s5 + $0x18] sm:$0xff]  ;;  %v1119_v19 = vld [vmem:[%s2821_s5 + $0x10] sm:$0xff] }
  0xea   :  { %1056 = vmatpush.msrb.mxu0 %v639_v21  ;;  %1080 = vmatpush.msrb.mxu2 %v675_v24  ;;  %v1118_v21 = vld [vmem:[%s2821_s5 + $0x8] sm:$0xff] }
  0xeb   :  { %1035 = vmatpush.msra.mxu1 %v594_v22  ;;  %940 = vmatpush.msra.mxu3 %v626_v23  ;;  %v1147_v22 = vld [vmem:[%s2821_s5 + $0xf0] sm:$0xff]  ;;  %v1117_v23 = vld [vmem:[%s2821_s5] sm:$0xff]  ;;  %v1146_v24 = vld [vmem:[%s2821_s5 + $0xe8] sm:$0xff] }
  0xec   :  { %1057 = vmatpush.msrb.mxu0 %v636_v26  ;;  %1081 = vmatpush.msrb.mxu2 %v672_v29  ;;  %v1145_v26 = vld [vmem:[%s2821_s5 + $0xe0] sm:$0xff] }
  0xed   :  { %1036 = vmatpush.msra.mxu1 %v591_v27  ;;  %941 = vmatpush.msra.mxu3 %v623_v28  ;;  %v1144_v27 = vld [vmem:[%s2821_s5 + $0xd8] sm:$0xff]  ;;  %v1143_v28 = vld [vmem:[%s2821_s5 + $0xd0] sm:$0xff]  ;;  %v2700_v29 = vld [vmem:[%s2823_s4] sm:$0x7] }
  0xee   :  { %1058 = vmatpush.msrb.mxu0 %v633_v31  ;;  %1082 = vmatpush.msrb.mxu2 %v669_v33  ;;  %v738_v31 = vperm.slane %v2700_v29, 0  ;;  %v1141_v33 = vld [vmem:[%s2821_s5 + $0xc0] sm:$0xff] }
  0xef   :  { %1037 = vmatpush.msra.mxu1 %v588_v10  ;;  %942 = vmatpush.msra.mxu3 %v620_v32  ;;  %v1142_v10 = vld [vmem:[%s2821_s5 + $0xc8] sm:$0xff] }
  0xf0   :  { %1291 = vmatmul.msk.f32.vlgmr.msrb.gmra.mxu1 %vm744_vm8, %v2377_v49  ;;  %1059 = vmatpush.msrb.mxu0 %v630_v34 }
  0xf1   :  { %943 = vmatpush.msra.mxu3 %v617_v0  ;;  %1038 = vmatpush.msra.mxu1 %v585_v35  ;;  %v1140_v0 = vld [vmem:[%s2821_s5 + $0xb8] sm:$0xff] }
  0xf2   :  { %1083 = vmatpush.msrb.mxu2 %v666_v36  ;;  %944 = vmatmul.f32.vlgmr.msra.gmra.mxu3 %v2299_v17  ;;  %v1139_v36 = vld [vmem:[%s2821_s5 + $0xb0] sm:$0xff] }
  0xf3   :  { %1008 = vmatpush.msrb.mxu3 %v567_v53  ;;  %1060 = vmatpush.msrb.mxu0 %v627_v38  ;;  %v1138_v38 = vld [vmem:[%s2821_s5 + $0xa8] sm:$0xff] }
  0xf4   :  { %1084 = vmatmul.f32.vlgmr.msrb.gmra.mxu2 %v2327_v30  ;;  %1039 = vmatpush.msra.mxu1 %v582_v39  ;;  %v558_v30 = vld [vmem:[%s2819_s3 + $0x2b0] sm:$0xff] }
  0xf5   :  { %1009 = vmatpush.msrb.mxu3 %v564_v40  ;;  %1061 = vmatpush.msrb.mxu0 %v624_v41 }
  0xf6   :  { %1040 = vmatpush.msra.mxu1 %v579_v42 }
  0xf7   :  { %1010 = vmatpush.msrb.mxu3 %v561_v43  ;;  %1062 = vmatpush.msrb.mxu0 %v621_v44  ;;  %v1137_v43 = vld [vmem:[%s2821_s5 + $0xa0] sm:$0xff]  ;;  %v1136_v44 = vld [vmem:[%s2821_s5 + $0x98] sm:$0xff] }
  0xf8   :  { %1041 = vmatpush.msra.mxu1 %v576_v45 }
  0xf9   :  { %1011 = vmatpush.msrb.mxu3 %v558_v30  ;;  %1063 = vmatpush.msrb.mxu0 %v618_v46  ;;  %v1135_v30 = vld [vmem:[%s2821_s5 + $0x90] sm:$0xff]  ;;  %v1134_v46 = vld [vmem:[%s2821_s5 + $0x88] sm:$0xff] }
  0xfa   :  { %1042 = vmatpush.msra.mxu1 %v573_v47  ;;  %1064 = vmatmul.f32.vlgmr.msrb.gmra.mxu0 %v2299_v17  ;;  %v543_v17 = vld [vmem:[%s2819_s3 + $0x238] sm:$0xff] }
  0xfb   :  { %1012 = vmatpush.msrb.mxu3 %v555_v48  ;;  %1184 = vmatpush.msra.mxu0 %v1148_v20 }
  0xfc   :  { %1043 = vmatpush.msra.mxu1 %v570_v50  ;;  %v1133_v50 = vld [vmem:[%s2821_s5 + $0x80] sm:$0xff] }
  0xfd   :  { %1013 = vmatpush.msrb.mxu3 %v552_v51  ;;  %1044 = vmatmul.f32.vlgmr.msra.gmra.mxu1 %v2208_v37  ;;  %v534_v37 = vld [vmem:[%s2819_s3 + $0x1f0] sm:$0xff] }
  0xfe   :  { %1164 = vmatpush.msrb.mxu1 %v1132_v5  ;;  %1185 = vmatpush.msra.mxu0 %v1147_v22 }
  0xff   :  { %1014 = vmatpush.msrb.mxu3 %v549_v52 }
 0x100   :  { %1165 = vmatpush.msrb.mxu1 %v1131_v6  ;;  %1186 = vmatpush.msra.mxu0 %v1146_v24  ;;  %v1153_v6 = vld [vmem:[%s2821_s5 + $0x120] sm:$0xff] }
 0x101   :  { %1015 = vmatpush.msrb.mxu3 %v546_v54 }
 0x102   :  { %1166 = vmatpush.msrb.mxu1 %v1130_v7  ;;  %1187 = vmatpush.msra.mxu0 %v1145_v26 }
 0x103   :  { %1016 = vmatpush.msrb.mxu3 %v543_v17  ;;  %v739_v17 = vperm.slane %v2700_v29, 1 }
 0x104   :  { %1167 = vmatpush.msrb.mxu1 %v1129_v8  ;;  %1188 = vmatpush.msra.mxu0 %v1144_v27  ;;  %v1152_v8 = vld [vmem:[%s2821_s5 + $0x118] sm:$0xff] }
 0x105   :  { %1017 = vmatpush.msrb.mxu3 %v540_v55 }
 0x106   :  { %1168 = vmatpush.msrb.mxu1 %v1128_v9  ;;  %1189 = vmatpush.msra.mxu0 %v1143_v28  ;;  %v1151_v9 = vld [vmem:[%s2821_s5 + $0x110] sm:$0xff] }
 0x107   :  { %1018 = vmatpush.msrb.mxu3 %v537_v56 }
 0x108   :  { %1190 = vmatpush.msra.mxu0 %v1142_v10  ;;  %v1240_v10 = vld [vmem:[%s2824_s7 + $0x68] sm:$0xff] }
 0x109   :  { %1019 = vmatpush.msrb.mxu3 %v534_v37 }
 0x10a   :  { %1191 = vmatpush.msra.mxu0 %v1141_v33  ;;  %v1238_v33 = vld [vmem:[%s2824_s7 + $0x58] sm:$0xff] }
 0x10b   :  { %1020 = vmatpush.msrb.mxu3 %v531_v57 }
 0x10c   :  { %1192 = vmatpush.msra.mxu0 %v1140_v0  ;;  %v1236_v0 = vld [vmem:[%s2824_s7 + $0x48] sm:$0xff] }
 0x10d   :  { %1021 = vmatpush.msrb.mxu3 %v528_v58 }
 0x10e   :  { %1193 = vmatpush.msra.mxu0 %v1139_v36  ;;  %v1234_v36 = vld [vmem:[%s2824_s7 + $0x38] sm:$0xff] }
 0x10f   :  { %1022 = vmatpush.msrb.mxu3 %v525_v59 }
 0x110   :  { %1194 = vmatpush.msra.mxu0 %v1138_v38  ;;  %v1232_v38 = vld [vmem:[%s2824_s7 + $0x28] sm:$0xff] }
 0x111   :  { %1023 = vmatpush.msrb.mxu3 %v522_v60 }
 0x112   :  { %1024 = vmatmul.f32.vlgmr.msrb.gmra.mxu3 %v2189_v25  ;;  %v720_v25 = vld [vmem:[%s2819_s3 + $0x7c0] sm:$0xff]  ;;  %1195 = vmatpush.msra.mxu0 %v1137_v43 }
 0x113   :  { %1096 = vmatpush.msra.mxu3 %v735_v61  ;;  %v1227_v43 = vld [vmem:[%s2824_s7] sm:$0xff] }
 0x114   :  { %1196 = vmatpush.msra.mxu0 %v1136_v44  ;;  %v14_v44 = vstv %s2825_s8 }
 0x115   :  { %1097 = vmatpush.msra.mxu3 %v732_v62  ;;  %15 = vst [vmem:[#allocation2] sm:$0x1] %v14_v44 }
 0x116   :  { %1197 = vmatpush.msra.mxu0 %v1135_v30 }
 0x117   :  { %1098 = vmatpush.msra.mxu3 %v729_v63 }
 0x118   :  { %1198 = vmatpush.msra.mxu0 %v1134_v46 }
 0x119   :  { %1099 = vmatpush.msra.mxu3 %v726_v1  ;;  %v1156_v1 = vld [vmem:[%s2821_s5 + $0x138] sm:$0xff] }
 0x11a   :  { %1199 = vmatpush.msra.mxu0 %v1133_v50 }
 0x11b   :  { %1100 = vmatpush.msra.mxu3 %v723_v2  ;;  %v1155_v2 = vld [vmem:[%s2821_s5 + $0x130] sm:$0xff] }
 0x11d   :  { %1101 = vmatpush.msra.mxu3 %v720_v25 }
 0x11f   :  { %1102 = vmatpush.msra.mxu3 %v717_v3 }
 0x121   :  { %1103 = vmatpush.msra.mxu3 %v714_v4  ;;  %v1154_v4 = vld [vmem:[%s2821_s5 + $0x128] sm:$0xff] }
 0x122   :  { %1292 = vmatmul.msk.f32.vlgmr.msra.gmra.mxu3 %vm744_vm8, %v2377_v49  ;;  %v1127_v49 = vld [vmem:[%s2821_s5 + $0x50] sm:$0xff] }
 0x123   :  { %1169 = vmatpush.msrb.mxu1 %v1127_v49  ;;  %1212 = vmatpush.msrb.mxu3 %v1156_v1  ;;  %v1150_v49 = vld [vmem:[%s2821_s5 + $0x108] sm:$0xff] }
 0x125   :  { %1170 = vmatpush.msrb.mxu1 %v1126_v11  ;;  %1213 = vmatpush.msrb.mxu3 %v1155_v2  ;;  %v1149_v11 = vld [vmem:[%s2821_s5 + $0x100] sm:$0xff] }
 0x127   :  { %1171 = vmatpush.msrb.mxu1 %v1125_v12  ;;  %1214 = vmatpush.msrb.mxu3 %v1154_v4  ;;  %v740_v12 = vperm.slane %v2700_v29, 2  ;;  %v1242_v29 = vld [vmem:[%s2824_s7 + $0x78] sm:$0xff] }
 0x128   :  { %1247 = vmatpush.msra.mxu2 %v1242_v29 }
 0x129   :  { %1172 = vmatpush.msrb.mxu1 %v1124_v13  ;;  %1215 = vmatpush.msrb.mxu3 %v1153_v6 }
 0x12b   :  { %1173 = vmatpush.msrb.mxu1 %v1123_v14  ;;  %1216 = vmatpush.msrb.mxu3 %v1152_v8 }
 0x12d   :  { %1174 = vmatpush.msrb.mxu1 %v1122_v15  ;;  %1217 = vmatpush.msrb.mxu3 %v1151_v9 }
 0x12f   :  { %1175 = vmatpush.msrb.mxu1 %v1121_v16  ;;  %1218 = vmatpush.msrb.mxu3 %v1150_v49 }
 0x130   :  { %v785_v35 = vpop.f32.mrf.mxu2 }
 0x131   :  { %1176 = vmatpush.msrb.mxu1 %v1120_v18  ;;  %1219 = vmatpush.msrb.mxu3 %v1149_v11 }
 0x133   :  { %1177 = vmatpush.msrb.mxu1 %v1119_v19  ;;  %v805_v40 = vpop.f32.mrf.mxu0 }
 0x135   :  { %1178 = vmatpush.msrb.mxu1 %v1118_v21 }
 0x137   :  { %1179 = vmatpush.msrb.mxu1 %v1117_v23 }
 0x13a   :  { %v925_v58 = vpop.f32.mrf.mxu2 }
 0x13b   :  { %v885_v55 = vpop.f32.mrf.mxu0 }
 0x13c   :  { %v886_v37 = vadd.f32 %v885_v55, %v739_v17  ;;  %v1295_v17 = vld [vmem:[#allocation2] ss:$0 sm:$0xff] }
 0x140   :  { %v765_v32 = vpop.f32.mrf.mxu3 }
 0x141   :  { %v766_v34 = vadd.f32 %v765_v32, %v738_v31  ;;  %v1241_v31 = vld [vmem:[%s2824_s7 + $0x70] sm:$0xff]  ;;  %v1239_v32 = vld [vmem:[%s2824_s7 + $0x60] sm:$0xff] }
 0x142   :  { %1248 = vmatpush.msra.mxu2 %v1241_v31 }
 0x143   :  { %v786_v53 = vadd.f32 %v785_v35, %v766_v34  ;;  %v1237_v34 = vld [vmem:[%s2824_s7 + $0x50] sm:$0xff]  ;;  %v1235_v35 = vld [vmem:[%s2824_s7 + $0x40] sm:$0xff] }
 0x144   :  { %1249 = vmatpush.msra.mxu2 %v1240_v10 }
 0x145   :  { %v806_v41 = vadd.f32 %v805_v40, %v786_v53  ;;  %v1233_v53 = vld [vmem:[%s2824_s7 + $0x30] sm:$0xff]  ;;  %v1230_v40 = vld [vmem:[%s2824_s7 + $0x18] sm:$0xff] }
 0x146   :  { %1250 = vmatpush.msra.mxu2 %v1239_v32 }
 0x147   :  { %v825_v42 = vpop.f32.mrf.mxu1 }
 0x148   :  { %v826_v45 = vadd.f32 %v825_v42, %v806_v41  ;;  %1251 = vmatpush.msra.mxu2 %v1238_v33  ;;  %v1229_v41 = vld [vmem:[%s2824_s7 + $0x10] sm:$0xff]  ;;  %v1228_v42 = vld [vmem:[%s2824_s7 + $0x8] sm:$0xff] }
 0x14a   :  { %1252 = vmatpush.msra.mxu2 %v1237_v34 }
 0x14c   :  { %1253 = vmatpush.msra.mxu2 %v1236_v0 }
 0x14e   :  { %1254 = vmatpush.msra.mxu2 %v1235_v35 }
 0x150   :  { %v905_v56 = vpop.f32.mrf.mxu1  ;;  %1255 = vmatpush.msra.mxu2 %v1234_v36 }
 0x151   :  { %v906_v57 = vadd.f32 %v905_v56, %v886_v37 }
 0x152   :  { %v845_v39 = vpop.f32.mrf.mxu3  ;;  %1256 = vmatpush.msra.mxu2 %v1233_v53 }
 0x153   :  { %v846_v47 = vadd.f32 %v845_v39, %v826_v45  ;;  %v926_v59 = vadd.f32 %v925_v58, %v906_v57  ;;  %v1231_v39 = vld [vmem:[%s2824_s7 + $0x20] sm:$0xff] }
 0x154   :  { %v1005_v13 = vpop.f32.mrf.mxu2  ;;  %1257 = vmatpush.msra.mxu2 %v1232_v38  ;;  %v1294_v45 = vld [vmem:[%s2822_s6] ss:$0 sm:$0xff] }
 0x155   :  { %v965_v62 = vpop.f32.mrf.mxu0  ;;  %v1006_v15 = vadd.f32 %v1005_v13, %v740_v12 }
 0x156   :  { %1258 = vmatpush.msra.mxu2 %v1231_v39 }
 0x158   :  { %1259 = vmatpush.msra.mxu2 %v1230_v40 }
 0x15a   :  { %1260 = vmatpush.msra.mxu2 %v1229_v41 }
 0x15c   :  { %1261 = vmatpush.msra.mxu2 %v1228_v42 }
 0x15d   :  { %v865_v48 = vpop.f32.mrf.mxu3 }
 0x15e   :  { %v866_v51 = vadd.f32 %v865_v48, %v846_v47  ;;  %1262 = vmatpush.msra.mxu2 %v1227_v43 }
 0x160   :  { %vm1108_vm9 = vcmp.ge.f32.partialorder %v866_v51, 0.0  ;;  %v1111_v52 = vmul.f32 0.2, %v866_v51 }
 0x162   :  { %v1114_v54 = vsel %vm1108_vm9, %v866_v51, %v1111_v52 }
 0x163   :  { %1180 = vmatmul.f32.vlgmr.msrb.gmra.mxu1 %v1114_v54 }
 0x16d   :  { %v985_v25 = vpop.f32.mrf.mxu1 }
 0x175   :  { %v945_v60 = vpop.f32.mrf.mxu3 }
 0x176   :  { %v946_v61 = vadd.f32 %v945_v60, %v926_v59 }
 0x177   :  { %v1065_v20 = vpop.f32.mrf.mxu0  ;;  %v1085_v22 = vpop.f32.mrf.mxu2 }
 0x178   :  { %v966_v63 = vadd.f32 %v965_v62, %v946_v61 }
 0x17a   :  { %v986_v3 = vadd.f32 %v985_v25, %v966_v63  ;;  %v1045_v18 = vpop.f32.mrf.mxu1 }
 0x17c   :  { %vm1109_vm10 = vcmp.ge.f32.partialorder %v986_v3, 0.0  ;;  %v1112_v5 = vmul.f32 0.2, %v986_v3 }
 0x17e   :  { %v1115_v7 = vsel %vm1109_vm10, %v986_v3, %v1112_v5 }
 0x17f   :  { %1200 = vmatmul.f32.vlgmr.msra.gmra.mxu0 %v1115_v7 }
 0x195   :  { %v1025_v14 = vpop.f32.mrf.mxu3 }
 0x196   :  { %v1026_v16 = vadd.f32 %v1025_v14, %v1006_v15 }
 0x198   :  { %v1046_v19 = vadd.f32 %v1045_v18, %v1026_v16 }
 0x19a   :  { %v1066_v21 = vadd.f32 %v1065_v20, %v1046_v19 }
 0x19c   :  { %v1086_v23 = vadd.f32 %v1085_v22, %v1066_v21 }
 0x1a5   :  { %v1105_v24 = vpop.f32.mrf.mxu3 }
 0x1a6   :  { %v1106_v26 = vadd.f32 %v1105_v24, %v1086_v23 }
 0x1a8   :  { %vm1110_vm11 = vcmp.ge.f32.partialorder %v1106_v26, 0.0  ;;  %v1113_v27 = vmul.f32 0.2, %v1106_v26 }
 0x1aa   :  { %v1116_v28 = vsel %vm1110_vm11, %v1106_v26, %v1113_v27 }
 0x1ab   :  { %1293 = vmatmul.msk.f32.vlgmr.msrb.gmra.mxu3 %vm744_vm8, %v1116_v28 }
 0x1e0   :  { %v1181_v30 = vpop.f32.mrf.mxu1 }
 0x1e1   :  { %v1182_v47 = vadd.f32 %v1294_v45, %v1181_v30 }
 0x1fc   :  { %v1201_v46 = vpop.f32.mrf.mxu0 }
 0x1fd   :  { %v1202_v48 = vadd.f32 %v1201_v46, %v1182_v47 }
 0x22e   :  { %v1221_v50 = vpop.f32.mrf.mxu3 }
 0x22f   :  { %v1222_v51 = vadd.f32 %v1221_v50, %v1202_v48 }
 0x231   :  { %vm1224_vm12 = vcmp.ge.f32.partialorder %v1222_v51, 0.0  ;;  %v1225_v52 = vmul.f32 0.2, %v1222_v51 }
 0x233   :  { %v1226_v54 = vsel %vm1224_vm12, %v1222_v51, %v1225_v52 }
 0x234   :  { %1263 = vmatmul.f32.vlgmr.msra.gmra.mxu2 %v1226_v54 }
 0x2b7   :  { %v1264_v55 = vpop.f32.mrf.mxu2 }
 0x2b8   :  { %v1265_v56 = vadd.f32 %v1295_v17, %v1264_v55 }
 0x2ba   :  { %v1267_v37 = vsub.f32 0.0, %v1265_v56 }
 0x2bc   :  { %v1268_v57 = vmul.f32 1.442695, %v1267_v37 }
 0x2be   :  { %1296 = vpow2.f32 %v1268_v57 }
 0x2c4   :  { %v1297_v58 = vpop.eup %1296 }
 0x2c5   :  { %v1270_v59 = vadd.f32 1.0, %v1297_v58 }
 0x2c7   :  { %1298 = vrcp.f32 %v1270_v59 }
 0x2cd   :  { %v1299_v60 = vpop.eup %1298 }
 0x2ce   :  { %1273 = vst.msk [vmem:[%s2826_s9] sm:$0x3] %vm1272_vm13, %v1299_v60 }

</bundles_post_ra>
